<compile_context>
chip_gen: v6e
topology: v6e:2x2x1
jax: 0.10.0
libtpu: 0.0.40
codegen_flags: <defaults>
</compile_context>

<pallas_src>
import functools
import math

import jax
import jax.numpy as jnp
from jax import lax
from jax.experimental import pallas as pl
from jax.experimental.pallas import tpu as pltpu


# ----------------------------------------------------------------------------
# Kernel 1: per-(batch, head) Q/K/V projections and QEr = Q @ Er^T.
# ----------------------------------------------------------------------------
def qkv_qer_kernel(x_ref, wq_ref, bq_ref, wk_ref, bk_ref, wv_ref, bv_ref,
                   er_ref, qo_ref, ko_ref, vo_ref, qer_ref):
    x = x_ref[0]                                   # (S, D) f32
    xb = x.astype(jnp.bfloat16)                    # bf16 MXU operands, f32 accum

    q = jnp.dot(xb, wq_ref[...], preferred_element_type=jnp.float32) + bq_ref[...]
    k = jnp.dot(xb, wk_ref[...], preferred_element_type=jnp.float32) + bk_ref[...]
    v = jnp.dot(xb, wv_ref[...], preferred_element_type=jnp.float32) + bv_ref[...]

    # QEr[i, m] = q_i . Er[start + m]   (contract the head dim of both operands)
    qer = lax.dot_general(q, er_ref[...], (((1,), (1,)), ((), ())),
                          preferred_element_type=jnp.float32)        # (S, S)

    qo_ref[0, 0] = q
    ko_ref[0, 0] = k
    vo_ref[0, 0] = v
    qer_ref[0, 0] = qer


# ----------------------------------------------------------------------------
# Kernel 2: one (batch, query-tile) step: causal relative attention over the
# full K/V, then residual + LayerNorm1 + FFN(ReLU) + residual + LayerNorm2.
# ----------------------------------------------------------------------------
def attn_ffn_kernel(x_ref, q_ref, k_ref, v_ref, srel_ref,
                    g1_ref, beta1_ref, w1_ref, b1_ref, w2_ref, b2_ref,
                    g2_ref, beta2_ref, o_ref, acc_ref, *, num_heads):
    tq = q_ref.shape[2]
    S = k_ref.shape[2]
    dh = q_ref.shape[3]
    inv_sqrt = 1.0 / math.sqrt(dh)

    # causal mask for this query tile (rows are global indices qt*tq + i)
    qt = pl.program_id(1)
    row = qt * tq + lax.broadcasted_iota(jnp.int32, (tq, S), 0)
    col = lax.broadcasted_iota(jnp.int32, (tq, S), 1)
    causal = col <= row

    for h in range(num_heads):                     # static unroll over heads
        q_h = q_ref[0, h]                          # (tq, dh) f32
        k_h = k_ref[0, h]                          # (S,  dh) f32
        v_h = v_ref[0, h]                          # (S,  dh) f32

        qk = lax.dot_general(q_h, k_h, (((1,), (1,)), ((), ())),
                             preferred_element_type=jnp.float32)     # (tq, S)
        scores = (qk + srel_ref[0, h]) * inv_sqrt
        scores = jnp.where(causal, scores, -jnp.inf)

        m = jnp.max(scores, axis=-1, keepdims=True)
        e = jnp.exp(scores - m)
        denom = jnp.sum(e, axis=-1, keepdims=True)
        p = e * pl.reciprocal(denom, approx=True)                    # softmax

        # per-head context written straight into the lane-aligned scratch slab
        acc_ref[:, h * dh:(h + 1) * dh] = jnp.dot(
            p, v_h, preferred_element_type=jnp.float32)

    x = x_ref[0]                                   # (tq, D) f32

    # --- residual + LayerNorm 1 ---
    x1 = x + acc_ref[...]
    mu1 = jnp.mean(x1, axis=-1, keepdims=True)
    var1 = jnp.mean((x1 - mu1) ** 2, axis=-1, keepdims=True)
    xn1 = (x1 - mu1) * lax.rsqrt(var1 + 1e-5) * g1_ref[...] + beta1_ref[...]

    # --- feed forward (bf16 MXU operands, f32 accumulation) ---
    h1 = jnp.dot(xn1.astype(jnp.bfloat16), w1_ref[...],
                 preferred_element_type=jnp.float32) + b1_ref[...]
    h1 = jnp.maximum(h1, 0.0)
    ff = jnp.dot(h1.astype(jnp.bfloat16), w2_ref[...],
                 preferred_element_type=jnp.float32) + b2_ref[...]

    # --- residual + LayerNorm 2 ---
    x2 = xn1 + ff
    mu2 = jnp.mean(x2, axis=-1, keepdims=True)
    var2 = jnp.mean((x2 - mu2) ** 2, axis=-1, keepdims=True)
    o_ref[0] = (x2 - mu2) * lax.rsqrt(var2 + 1e-5) * g2_ref[...] + beta2_ref[...]


# ----------------------------------------------------------------------------
# Wrapper
# ----------------------------------------------------------------------------
def decoder_block(x, params, num_heads, *, tile_q=128):
    B, S, D = x.shape
    assert D % num_heads == 0
    dh = D // num_heads
    d_ff = params["w1"].shape[1]
    max_len = params["Er"].shape[0]
    assert S <= max_len
    tile_q = min(tile_q, S)
    assert S % tile_q == 0
    nq = S // tile_q

    f32, bf16 = jnp.float32, jnp.bfloat16

    # parameter prep (glue): relative-embedding slice + bf16 weight copies
    er = params["Er"][max_len - S:, :].astype(f32)                  # (S, dh)
    wq, wk, wv = (params[n].astype(bf16) for n in ("wq", "wk", "wv"))
    w1, w2 = params["w1"].astype(bf16), params["w2"].astype(bf16)

    cparams = pltpu.CompilerParams(
        dimension_semantics=("parallel", "parallel"),
        vmem_limit_bytes=48 * 1024 * 1024)

    # ---- call 1: Q/K/V per head + QEr ---------------------------------------
    head_w = pl.BlockSpec((D, dh), lambda b, h: (0, h))
    head_b = pl.BlockSpec((1, dh), lambda b, h: (0, h))
    head_out = pl.BlockSpec((1, 1, S, dh), lambda b, h: (b, h, 0, 0))

    q, k, v, qer = pl.pallas_call(
        qkv_qer_kernel,
        out_shape=(
            jax.ShapeDtypeStruct((B, num_heads, S, dh), f32),
            jax.ShapeDtypeStruct((B, num_heads, S, dh), f32),
            jax.ShapeDtypeStruct((B, num_heads, S, dh), f32),
            jax.ShapeDtypeStruct((B, num_heads, S, S), f32),
        ),
        grid=(B, num_heads),
        in_specs=[
            pl.BlockSpec((1, S, D), lambda b, h: (b, 0, 0)),        # x
            head_w, head_b,                                         # wq, bq
            head_w, head_b,                                         # wk, bk
            head_w, head_b,                                         # wv, bv
            pl.BlockSpec((S, dh), lambda b, h: (0, 0)),             # Er[start:]
        ],
        out_specs=(head_out, head_out, head_out,
                   pl.BlockSpec((1, 1, S, S), lambda b, h: (b, h, 0, 0))),
        compiler_params=cparams,
    )(x, wq, params["bq"], wk, params["bk"], wv, params["bv"], er)

    # ---- skew: identical to the PyTorch pad/reshape, pure layout glue -------
    padded = jnp.pad(qer, ((0, 0), (0, 0), (0, 0), (1, 0)))
    srel = padded.reshape(B, num_heads, S + 1, S)[:, :, 1:, :]       # (B,H,S,S)

    # ---- call 2: attention + residual/LN/FFN/LN ------------------------------
    # NOTE: on VMEM-tight chips (v7x) the invariant weight blocks below could
    # additionally be single-buffered (pipeline_mode=pl.Buffered(1)).
    kernel = functools.partial(attn_ffn_kernel, num_heads=num_heads)
    vec_d = pl.BlockSpec((1, D), lambda b, t: (0, 0))

    return pl.pallas_call(
        kernel,
        out_shape=jax.ShapeDtypeStruct((B, S, D), f32),
        grid=(B, nq),
        in_specs=[
            pl.BlockSpec((1, tile_q, D), lambda b, t: (b, t, 0)),               # x
            pl.BlockSpec((1, num_heads, tile_q, dh), lambda b, t: (b, 0, t, 0)),  # q
            pl.BlockSpec((1, num_heads, S, dh), lambda b, t: (b, 0, 0, 0)),     # k
            pl.BlockSpec((1, num_heads, S, dh), lambda b, t: (b, 0, 0, 0)),     # v
            pl.BlockSpec((1, num_heads, tile_q, S), lambda b, t: (b, 0, t, 0)),  # srel
            vec_d, vec_d,                                                       # ln1 g, b
            pl.BlockSpec((D, d_ff), lambda b, t: (0, 0)),                       # w1
            pl.BlockSpec((1, d_ff), lambda b, t: (0, 0)),                       # b1
            pl.BlockSpec((d_ff, D), lambda b, t: (0, 0)),                       # w2
            vec_d,                                                              # b2
            vec_d, vec_d,                                                       # ln2 g, b
        ],
        out_specs=pl.BlockSpec((1, tile_q, D), lambda b, t: (b, t, 0)),
        scratch_shapes=[pltpu.VMEM((tile_q, D), f32)],
        compiler_params=cparams,
    )(x, q, k, v, srel,
      params["g1"], params["beta1"], w1, params["b1"], w2, params["b2"],
      params["g2"], params["beta2"])


# ----------------------------------------------------------------------------
# Pure-JAX reference mirroring the PyTorch forward (eval mode, dropout = id).
# The five weight matmuls use bf16 operands + f32 accumulation, matching the
# kernel's MXU precision policy, so the comparison isolates algorithmic
# correctness (projections, skew, mask, softmax, LayerNorm, FFN).
# ----------------------------------------------------------------------------
def decoder_block_reference(x, params, num_heads):
    B, S, D = x.shape
    dh = D // num_heads
    max_len = params["Er"].shape[0]

    def mm(a, w):
        return jnp.dot(a.astype(jnp.bfloat16), w.astype(jnp.bfloat16),
                       preferred_element_type=jnp.float32)

    def layer_norm(v, g, b):
        mu = jnp.mean(v, -1, keepdims=True)
        var = jnp.mean((v - mu) ** 2, -1, keepdims=True)
        return (v - mu) * lax.rsqrt(var + 1e-5) * g + b

    k = mm(x, params["wk"]) + params["bk"]
    v = mm(x, params["wv"]) + params["bv"]
    q = mm(x, params["wq"]) + params["bq"]
    k_t = k.reshape(B, S, num_heads, dh).transpose(0, 2, 3, 1)      # (B,H,dh,S)
    v = v.reshape(B, S, num_heads, dh).transpose(0, 2, 1, 3)        # (B,H,S,dh)
    q = q.reshape(B, S, num_heads, dh).transpose(0, 2, 1, 3)        # (B,H,S,dh)

    er_t = params["Er"][max_len - S:, :].T                          # (dh, S)
    qer = q @ er_t                                                  # (B,H,S,S)
    padded = jnp.pad(qer, ((0, 0), (0, 0), (0, 0), (1, 0)))
    srel = padded.reshape(B, num_heads, S + 1, S)[:, :, 1:, :]
    attn = (q @ k_t + srel) / math.sqrt(dh)
    tril = jnp.tril(jnp.ones((S, S), bool))
    attn = jnp.where(tril[None, None], attn, -jnp.inf)
    attn = jax.nn.softmax(attn, axis=-1)
    out = (attn @ v).transpose(0, 2, 1, 3).reshape(B, S, D)

    x = layer_norm(x + out, params["g1"], params["beta1"])
    ff = mm(jnp.maximum(mm(x, params["w1"]) + params["b1"], 0.0),
            params["w2"]) + params["b2"]
    x = layer_norm(x + ff, params["g2"], params["beta2"])
    return x


# ----------------------------------------------------------------------------
if __name__ == "__main__":
    # Small but TPU-layout-friendly shapes: head dim = 128 (one lane tile),
    # seq_len == max_len (c['seq_len']) == 128.
    B, S, D, H, D_FF = 2, 128, 256, 2, 512
    dh = D // H
    MAX_LEN = S

    key = jax.random.PRNGKey(0)
    ks = jax.random.split(key, 16)
    n = lambda k, shape, s=0.1: (s * jax.random.normal(k, shape)).astype(jnp.float32)

    params = {
        "wq": n(ks[0], (D, D)), "bq": n(ks[1], (1, D)),
        "wk": n(ks[2], (D, D)), "bk": n(ks[3], (1, D)),
        "wv": n(ks[4], (D, D)), "bv": n(ks[5], (1, D)),
        "Er": jax.random.normal(ks[6], (MAX_LEN, dh)).astype(jnp.float32),
        "g1": jnp.ones((1, D), jnp.float32), "beta1": jnp.zeros((1, D), jnp.float32),
        "w1": n(ks[7], (D, D_FF)), "b1": n(ks[8], (1, D_FF)),
        "w2": n(ks[9], (D_FF, D)), "b2": n(ks[10], (1, D)),
        "g2": jnp.ones((1, D), jnp.float32), "beta2": jnp.zeros((1, D), jnp.float32),
    }
    x = jax.random.normal(ks[11], (B, S, D)).astype(jnp.float32)

    out = jax.block_until_ready(decoder_block(x, params, H))
    ref = jax.block_until_ready(decoder_block_reference(x, params, H))

    assert out.shape == (B, S, D)
    max_diff = float(jnp.max(jnp.abs(out - ref)))
    assert jnp.allclose(out, ref, atol=2e-2, rtol=2e-2), f"max abs diff {max_diff}"

    print("KERNEL_OK")
</pallas_src>

<mosaic_0001>
module attributes {stable_mosaic.version = 11 : i64} {
  func.func @qkv_qer_kernel(%arg0: i32, %arg1: i32, %arg2: memref<1x128x256xf32, #tpu.memory_space<vmem>>, %arg3: memref<256x128xbf16, #tpu.memory_space<vmem>>, %arg4: memref<1x128xf32, #tpu.memory_space<vmem>>, %arg5: memref<256x128xbf16, #tpu.memory_space<vmem>>, %arg6: memref<1x128xf32, #tpu.memory_space<vmem>>, %arg7: memref<256x128xbf16, #tpu.memory_space<vmem>>, %arg8: memref<1x128xf32, #tpu.memory_space<vmem>>, %arg9: memref<128x128xf32, #tpu.memory_space<vmem>>, %arg10: memref<1x1x128x128xf32, #tpu.memory_space<vmem>>, %arg11: memref<1x1x128x128xf32, #tpu.memory_space<vmem>>, %arg12: memref<1x1x128x128xf32, #tpu.memory_space<vmem>>, %arg13: memref<1x1x128x128xf32, #tpu.memory_space<vmem>>) attributes {dimension_semantics = [#tpu.dimension_semantics<parallel>, #tpu.dimension_semantics<parallel>], iteration_bounds = array<i64: 2, 2>, scalar_prefetch = 0 : i64, scratch_operands = 0 : i64, tpu.core_type = #tpu.core_type<tc>, window_params = [{transform_indices = @transform_0, window_bounds = array<i64: 1, 128, 256>}, {transform_indices = @transform_1, window_bounds = array<i64: 256, 128>}, {transform_indices = @transform_2, window_bounds = array<i64: 1, 128>}, {transform_indices = @transform_3, window_bounds = array<i64: 256, 128>}, {transform_indices = @transform_4, window_bounds = array<i64: 1, 128>}, {transform_indices = @transform_5, window_bounds = array<i64: 256, 128>}, {transform_indices = @transform_6, window_bounds = array<i64: 1, 128>}, {pipeline_mode = #tpu.pipeline_mode<synchronous>, transform_indices = @transform_7, window_bounds = array<i64: 128, 128>}, {transform_indices = @transform_8, window_bounds = array<i64: 1, 1, 128, 128>}, {transform_indices = @transform_9, window_bounds = array<i64: 1, 1, 128, 128>}, {transform_indices = @transform_10, window_bounds = array<i64: 1, 1, 128, 128>}, {transform_indices = @transform_11, window_bounds = array<i64: 1, 1, 128, 128>}]} {
    %c0 = arith.constant 0 : index
    %c0_0 = arith.constant 0 : index
    %c0_1 = arith.constant 0 : index
    %0 = vector.load %arg2[%c0, %c0_0, %c0_1] : memref<1x128x256xf32, #tpu.memory_space<vmem>>, vector<1x128x256xf32>
    %1 = vector.shape_cast %0 : vector<1x128x256xf32> to vector<128x256xf32>
    %2 = arith.truncf %1 : vector<128x256xf32> to vector<128x256xbf16>
    %c0_2 = arith.constant 0 : index
    %c0_3 = arith.constant 0 : index
    %3 = vector.load %arg3[%c0_2, %c0_3] : memref<256x128xbf16, #tpu.memory_space<vmem>>, vector<256x128xbf16>
    %cst = arith.constant dense<0.000000e+00> : vector<128x128xf32>
    %4 = tpu.matmul %2, %3, %cst {dimension_numbers = #tpu.dot_dimension_numbers<[1], [0], [0], [1], [0, 0, 1, 1], [], []>} : vector<128x256xbf16>, vector<256x128xbf16>, vector<128x128xf32> -> vector<128x128xf32>
    %c0_4 = arith.constant 0 : index
    %c0_5 = arith.constant 0 : index
    %5 = vector.load %arg4[%c0_4, %c0_5] : memref<1x128xf32, #tpu.memory_space<vmem>>, vector<1x128xf32>
    %6 = vector.broadcast %5 : vector<1x128xf32> to vector<128x128xf32>
    %7 = arith.addf %4, %6 : vector<128x128xf32>
    %c0_6 = arith.constant 0 : index
    %c0_7 = arith.constant 0 : index
    %8 = vector.load %arg5[%c0_6, %c0_7] : memref<256x128xbf16, #tpu.memory_space<vmem>>, vector<256x128xbf16>
    %cst_8 = arith.constant dense<0.000000e+00> : vector<128x128xf32>
    %9 = tpu.matmul %2, %8, %cst_8 {dimension_numbers = #tpu.dot_dimension_numbers<[1], [0], [0], [1], [0, 0, 1, 1], [], []>} : vector<128x256xbf16>, vector<256x128xbf16>, vector<128x128xf32> -> vector<128x128xf32>
    %c0_9 = arith.constant 0 : index
    %c0_10 = arith.constant 0 : index
    %10 = vector.load %arg6[%c0_9, %c0_10] : memref<1x128xf32, #tpu.memory_space<vmem>>, vector<1x128xf32>
    %11 = vector.broadcast %10 : vector<1x128xf32> to vector<128x128xf32>
    %12 = arith.addf %9, %11 : vector<128x128xf32>
    %c0_11 = arith.constant 0 : index
    %c0_12 = arith.constant 0 : index
    %13 = vector.load %arg7[%c0_11, %c0_12] : memref<256x128xbf16, #tpu.memory_space<vmem>>, vector<256x128xbf16>
    %cst_13 = arith.constant dense<0.000000e+00> : vector<128x128xf32>
    %14 = tpu.matmul %2, %13, %cst_13 {dimension_numbers = #tpu.dot_dimension_numbers<[1], [0], [0], [1], [0, 0, 1, 1], [], []>} : vector<128x256xbf16>, vector<256x128xbf16>, vector<128x128xf32> -> vector<128x128xf32>
    %c0_14 = arith.constant 0 : index
    %c0_15 = arith.constant 0 : index
    %15 = vector.load %arg8[%c0_14, %c0_15] : memref<1x128xf32, #tpu.memory_space<vmem>>, vector<1x128xf32>
    %16 = vector.broadcast %15 : vector<1x128xf32> to vector<128x128xf32>
    %17 = arith.addf %14, %16 : vector<128x128xf32>
    %c0_16 = arith.constant 0 : index
    %c0_17 = arith.constant 0 : index
    %18 = vector.load %arg9[%c0_16, %c0_17] : memref<128x128xf32, #tpu.memory_space<vmem>>, vector<128x128xf32>
    %cst_18 = arith.constant dense<0.000000e+00> : vector<128x128xf32>
    %19 = tpu.matmul %7, %18, %cst_18 {dimension_numbers = #tpu.dot_dimension_numbers<[1], [1], [0], [0], [0, 0, 1, 0], [], []>} : vector<128x128xf32>, vector<128x128xf32>, vector<128x128xf32> -> vector<128x128xf32>
    %c0_19 = arith.constant 0 : index
    %c0_20 = arith.constant 0 : index
    %c0_21 = arith.constant 0 : index
    %c0_22 = arith.constant 0 : index
    %20 = vector.load %arg10[%c0_19, %c0_20, %c0_21, %c0_22] : memref<1x1x128x128xf32, #tpu.memory_space<vmem>>, vector<1x1x128x128xf32>
    %21 = vector.shape_cast %20 : vector<1x1x128x128xf32> to vector<128x128xf32>
    %22 = vector.shape_cast %7 : vector<128x128xf32> to vector<1x1x128x128xf32>
    tpu.vector_store %arg10[%c0_19, %c0_20, %c0_21, %c0_22], %22 {strides = array<i32>} : memref<1x1x128x128xf32, #tpu.memory_space<vmem>>, vector<1x1x128x128xf32>,
    %c0_23 = arith.constant 0 : index
    %c0_24 = arith.constant 0 : index
    %c0_25 = arith.constant 0 : index
    %c0_26 = arith.constant 0 : index
    %23 = vector.load %arg11[%c0_23, %c0_24, %c0_25, %c0_26] : memref<1x1x128x128xf32, #tpu.memory_space<vmem>>, vector<1x1x128x128xf32>
    %24 = vector.shape_cast %23 : vector<1x1x128x128xf32> to vector<128x128xf32>
    %25 = vector.shape_cast %12 : vector<128x128xf32> to vector<1x1x128x128xf32>
    tpu.vector_store %arg11[%c0_23, %c0_24, %c0_25, %c0_26], %25 {strides = array<i32>} : memref<1x1x128x128xf32, #tpu.memory_space<vmem>>, vector<1x1x128x128xf32>,
    %c0_27 = arith.constant 0 : index
    %c0_28 = arith.constant 0 : index
    %c0_29 = arith.constant 0 : index
    %c0_30 = arith.constant 0 : index
    %26 = vector.load %arg12[%c0_27, %c0_28, %c0_29, %c0_30] : memref<1x1x128x128xf32, #tpu.memory_space<vmem>>, vector<1x1x128x128xf32>
    %27 = vector.shape_cast %26 : vector<1x1x128x128xf32> to vector<128x128xf32>
    %28 = vector.shape_cast %17 : vector<128x128xf32> to vector<1x1x128x128xf32>
    tpu.vector_store %arg12[%c0_27, %c0_28, %c0_29, %c0_30], %28 {strides = array<i32>} : memref<1x1x128x128xf32, #tpu.memory_space<vmem>>, vector<1x1x128x128xf32>,
    %c0_31 = arith.constant 0 : index
    %c0_32 = arith.constant 0 : index
    %c0_33 = arith.constant 0 : index
    %c0_34 = arith.constant 0 : index
    %29 = vector.load %arg13[%c0_31, %c0_32, %c0_33, %c0_34] : memref<1x1x128x128xf32, #tpu.memory_space<vmem>>, vector<1x1x128x128xf32>
    %30 = vector.shape_cast %29 : vector<1x1x128x128xf32> to vector<128x128xf32>
    %31 = vector.shape_cast %19 : vector<128x128xf32> to vector<1x1x128x128xf32>
    tpu.vector_store %arg13[%c0_31, %c0_32, %c0_33, %c0_34], %31 {strides = array<i32>} : memref<1x1x128x128xf32, #tpu.memory_space<vmem>>, vector<1x1x128x128xf32>,
    return
  }
  func.func @transform_0(%arg0: i32, %arg1: i32) -> (i32, i32, i32) {
    %c0_i32 = arith.constant 0 : i32
    %c0_i32_0 = arith.constant 0 : i32
    %c0_i32_1 = arith.constant 0 : i32
    return %arg0, %c0_i32, %c0_i32_0 : i32, i32, i32
  }
  func.func @transform_1(%arg0: i32, %arg1: i32) -> (i32, i32) {
    %c0_i32 = arith.constant 0 : i32
    %c0_i32_0 = arith.constant 0 : i32
    return %c0_i32, %arg1 : i32, i32
  }
  func.func @transform_2(%arg0: i32, %arg1: i32) -> (i32, i32) {
    %c0_i32 = arith.constant 0 : i32
    %c0_i32_0 = arith.constant 0 : i32
    return %c0_i32, %arg1 : i32, i32
  }
  func.func @transform_3(%arg0: i32, %arg1: i32) -> (i32, i32) {
    %c0_i32 = arith.constant 0 : i32
    %c0_i32_0 = arith.constant 0 : i32
    return %c0_i32, %arg1 : i32, i32
  }
  func.func @transform_4(%arg0: i32, %arg1: i32) -> (i32, i32) {
    %c0_i32 = arith.constant 0 : i32
    %c0_i32_0 = arith.constant 0 : i32
    return %c0_i32, %arg1 : i32, i32
  }
  func.func @transform_5(%arg0: i32, %arg1: i32) -> (i32, i32) {
    %c0_i32 = arith.constant 0 : i32
    %c0_i32_0 = arith.constant 0 : i32
    return %c0_i32, %arg1 : i32, i32
  }
  func.func @transform_6(%arg0: i32, %arg1: i32) -> (i32, i32) {
    %c0_i32 = arith.constant 0 : i32
    %c0_i32_0 = arith.constant 0 : i32
    return %c0_i32, %arg1 : i32, i32
  }
  func.func @transform_7(%arg0: i32, %arg1: i32) -> (i32, i32) {
    %c0_i32 = arith.constant 0 : i32
    %c0_i32_0 = arith.constant 0 : i32
    %c0_i32_1 = arith.constant 0 : i32
    return %c0_i32, %c0_i32_0 : i32, i32
  }
  func.func @transform_8(%arg0: i32, %arg1: i32) -> (i32, i32, i32, i32) {
    %c0_i32 = arith.constant 0 : i32
    %c0_i32_0 = arith.constant 0 : i32
    %c0_i32_1 = arith.constant 0 : i32
    return %arg0, %arg1, %c0_i32, %c0_i32_0 : i32, i32, i32, i32
  }
  func.func @transform_9(%arg0: i32, %arg1: i32) -> (i32, i32, i32, i32) {
    %c0_i32 = arith.constant 0 : i32
    %c0_i32_0 = arith.constant 0 : i32
    %c0_i32_1 = arith.constant 0 : i32
    return %arg0, %arg1, %c0_i32, %c0_i32_0 : i32, i32, i32, i32
  }
  func.func @transform_10(%arg0: i32, %arg1: i32) -> (i32, i32, i32, i32) {
    %c0_i32 = arith.constant 0 : i32
    %c0_i32_0 = arith.constant 0 : i32
    %c0_i32_1 = arith.constant 0 : i32
    return %arg0, %arg1, %c0_i32, %c0_i32_0 : i32, i32, i32, i32
  }
  func.func @transform_11(%arg0: i32, %arg1: i32) -> (i32, i32, i32, i32) {
    %c0_i32 = arith.constant 0 : i32
    %c0_i32_0 = arith.constant 0 : i32
    %c0_i32_1 = arith.constant 0 : i32
    return %arg0, %arg1, %c0_i32, %c0_i32_0 : i32, i32, i32, i32
  }
}

</mosaic_0001>

<bundles_post_ra>
// kernel: tpu_custom_call.1
= control target key start
LH: loop header
LB: loop body
LE: loop exit
PB: predicated region body
PF: predicated region fallthrough
CT: control target
= control target key end

     0   :  { %s3795_s0 = inlined_call_operand.hbm [shape: f32[2,128,256], index: 0, kind: input, shape index: {}]   ;;  %s3796_s1 = inlined_call_operand.hbm [shape: bf16[256,256], index: 1, kind: input, shape index: {}]   ;;  %s3797_s2 = inlined_call_operand.vmem [shape: f32[1,256], index: 2, kind: input, shape index: {}]   ;;  %s3798_s3 = inlined_call_operand.hbm [shape: bf16[256,256], index: 3, kind: input, shape index: {}]   ;;  %s3799_s4 = inlined_call_operand.vmem [shape: f32[1,256], index: 4, kind: input, shape index: {}]   ;;  %s3800_s5 = inlined_call_operand.hbm [shape: bf16[256,256], index: 5, kind: input, shape index: {}]   ;;  %s3801_s6 = inlined_call_operand.vmem [shape: f32[1,256], index: 6, kind: input, shape index: {}]   ;;  %s3802_s7 = inlined_call_operand.hbm [shape: f32[128,128], index: 7, kind: input, shape index: {}]   ;;  %s3803_s8 = inlined_call_operand.hbm [shape: f32[2,2,128,128], index: 8, kind: output, shape index: {0}]   ;;  %s3804_s9 = inlined_call_operand.hbm [shape: f32[2,2,128,128], index: 9, kind: output, shape index: {1}]   ;;  %s3805_s10 = inlined_call_operand.hbm [shape: f32[2,2,128,128], index: 10, kind: output, shape index: {2}]   ;;  %s3806_s11 = inlined_call_operand.hbm [shape: f32[2,2,128,128], index: 11, kind: output, shape index: {3}]  }
   0x1   :  { %3840 = sst [smem:[#allocation39_spill]] %s3795_s0 }
   0x2   :  { %3841 = sst [smem:[#allocation40_spill]] %s3796_s1 }
   0x3   :  { %3842 = sst [smem:[#allocation41_spill]] %s3797_s2 }
   0x4   :  { %3843 = sst [smem:[#allocation42_spill]] %s3798_s3 }
   0x5   :  { %3844 = sst [smem:[#allocation43_spill]] %s3799_s4 }
   0x6   :  { %3845 = sst [smem:[#allocation44_spill]] %s3800_s5 }
   0x7   :  { %3846 = sst [smem:[#allocation45_spill]] %s3801_s6 }
   0x8   :  { %3847 = sst [smem:[#allocation46_spill]] %s3802_s7 }
   0x9   :  { %3848 = sst [smem:[#allocation47_spill]] %s3803_s8 }
   0xa   :  { %3849 = sst [smem:[#allocation48_spill]] %s3804_s9 }
   0xb   :  { %3850 = sst [smem:[#allocation49_spill]] %s3805_s10 }
   0xc   :  { %3851 = sst [smem:[#allocation50_spill]] %s3806_s11 }
   0xd   :  { %17 = vsyncpa [#allocation3], 0 }
   0xe   :  { %19 = vsyncpa [#allocation3 + $0x1], 0 }
   0xf   :  { %20 = vsyncpa [#allocation6], 0 }
  0x10   :  { %22 = vsyncpa [#allocation6 + $0x1], 0 }
  0x11   :  { %23 = vsyncpa [#allocation9], 0 }
  0x12   :  { %25 = vsyncpa [#allocation9 + $0x1], 0 }
  0x13   :  { %26 = vsyncpa [#allocation4], 0 }
  0x14   :  { %28 = vsyncpa [#allocation4 + $0x1], 0 }
  0x15   :  { %29 = vsyncpa [#allocation13], 0 }
  0x16   :  { %31 = vsyncpa [#allocation13 + $0x1], 0 }
  0x17   :  { %32 = vsyncpa [#allocation16], 0 }
  0x18   :  { %34 = vsyncpa [#allocation16 + $0x1], 0  ;;  %s3025_s17 = smov 0   ;;  %s3027_s18 = smov 0  }
  0x19   :  { %s3029_s19 = smov 0   ;;  %s3031_s20 = smov 0  }
  0x1a   :  { %s3033_s21 = smov 0   ;;  %s3035_s22 = smov 0  }
  0x1b   :  { %s3037_s23 = smov 0   ;;  %s3039_s24 = smov 0  }
  0x1c   :  { %s3041_s25 = smov 0   ;;  %s3043_s26 = smov 0  }
  0x1d   :  { %s3045_s27 = smov 0   ;;  %s3047_s28 = smov 0  }
  0x1e   :  { %s3049_s29 = smov 0   ;;  %s3051_s30 = smov 0  }
  0x1f LB: > { %3852 = sst [smem:[#allocation24_spill]] %s2894_s17  ;;  %s3092_s12 = sadd.s32 4294967295, %s2946_s30   ;;  %s2946_s30 = sphi %s3051_s30, %s40_s30   ;;  %s2942_s29 = sphi %s3049_s29, %s3928_s29   ;;  %s2938_s28 = sphi %s3047_s28, %s3922_s28   ;;  %s2934_s27 = sphi %s3045_s27, %s3927_s27   ;;  %s2930_s26 = sphi %s3043_s26, %s3921_s26   ;;  %s2926_s25 = sphi %s3041_s25, %s3926_s25   ;;  %s2922_s24 = sphi %s3039_s24, %s3925_s24   ;;  %s2918_s23 = sphi %s3037_s23, %s3920_s23   ;;  %s2914_s22 = sphi %s3035_s22, %s3919_s22   ;;  %s2910_s21 = sphi %s3033_s21, %s3918_s21   ;;  %s2906_s20 = sphi %s3031_s20, %s3917_s20   ;;  %s2902_s19 = sphi %s3029_s19, %s3924_s19   ;;  %s2898_s18 = sphi %s3027_s18, %s3923_s18   ;;  %s2894_s17 = sphi %s3025_s17, %s3916_s17  }
  0x20   : > { %3853 = sst [smem:[#allocation25_spill]] %s2898_s18  ;;  %s3809_s13 = sadd.s32 4294967294, %s2946_s30  }
  0x21   : > { %3854 = sst [smem:[#allocation26_spill]] %s2910_s21  ;;  %p72_p0 = scmp.ne.s32.totalorder %s2922_s24, %s2918_s23 }
  0x22   : > { %3855 = sst [smem:[#allocation27_spill]] %s2914_s22  ;;  %p3822_p1 = scmp.eq.s32.totalorder %s3092_s12, 0 }
  0x23   : > { %3856 = sst [smem:[#allocation28_spill]] %s2922_s24  ;;  %p98_p2 = scmp.ne.s32.totalorder %s2910_s21, %s2906_s20 }
  0x24   : > { %3857 = sst [smem:[#allocation29_spill]] %s2930_s26  ;;  %p274_p3 = scmp.ne.s32.totalorder %s2902_s19, %s2898_s18 }
  0x25   : > { %3858 = sst [smem:[#allocation30_spill]] %s2934_s27  ;;  %p3102_p4 = por %p3822_p1, %p72_p0 }
  0x26   : > { %3859 = sst [smem:[#allocation31_spill]] %s2938_s28  ;;  %p275_p5 = scmp.eq.s32.totalorder %s3092_s12, 3 }
  0x27   : > { %3860 = sst [smem:[#allocation32_spill]] %s3092_s12  ;;  %p3109_p6 = por %p98_p2, %p3822_p1 }
  0x28   : > { %s3861_s14 = scalar_select %p3102_p4, 1, 0 }
  0x29   : > { %s3863_s15 = scalar_select %p3109_p6, 1, 0 }
  0x2a   : > { %3862 = sst [smem:[#allocation33_spill]] %s3861_s14  ;;  %p280_p7 = scmp.ne.s32.totalorder %s2898_s18, %s2894_s17 }
  0x2b   : > { %3864 = sst [smem:[#allocation34_spill]] %s3863_s15  ;;  %p3115_p8 = por %p275_p5, %p274_p3 }
  0x2c   : > { %p281_p9 = scmp.eq.s32.totalorder %s3809_s13, 3  ;;  %p1971_p10 = scmp.ge.s32.totalorder %s2946_s30, 1 }
  0x2d   : > { %s3865_s16 = scalar_select %p3115_p8, 1, 0 }
  0x2e   : > { %p372_p11 = scmp.lt.s32.totalorder %s2946_s30, 5  ;;  %p3123_p12 = por %p281_p9, %p280_p7 }
  0x2f   : > { %3866 = sst [smem:[#allocation35_spill]] %s3865_s16  ;;  %s2948_s11 = smov [#allocation10]  }
  0x30   : > { %s3867_s20 = scalar_select %p3123_p12, 1, 0 }
  0x31   : > { %p3127_p13 = pnand %p1971_p10, %p372_p11  ;;  %s384_s8 = sshll.u32 %s2948_s11, 4  ;;  %s385_s8 = int_to_ptr.vmem [resolvable:$true] %s384_s8 }
  0x32   : > { %3868 = sst [smem:[#allocation36_spill]] %s3867_s20  ;;  %s2577_s13 = scalar_lea.vmem %s385_s8, 2048 }
  0x33   : > { %p2363_p0 = pneg %p3127_p13  ;;  %p2578_p5 = scmp.ne.s32.totalorder %s385_s8, %s2577_s13 }
  0x34   : > { %p2585_p9 = scmp.lt.s32.totalorder %s385_s8, %s385_s8  ;;  %p2586_p6 = scmp.lt.s32.totalorder %s2577_s13, %s2577_s13 }
  0x35   : > { %p2364_p2 = pnand %p2363_p0, %p3822_p1 }
  0x36   : > { %p2587_p12 = por %p2586_p6, %p2585_p9 }
  0x37   : > { %p2568_p3 = pneg %p2364_p2 }
  0x39   : > { %p2580_p8 = pnand %p2578_p5, %p2568_p3 }
  0x3b   : > { %p2581_p7 = pneg %p2580_p8 }
  0x3d   : > { %p2588_p10 = pnand %p2587_p12, %p2581_p7 }
  0x3f   : > { %2591 = shalt.err (!%p2588_p10)
}
  0x40   : > { %s3818_s20 = smov 128   ;;  %s2950_s11 = smov 8  }
  0x41   : > { %s3870_s7 = sld [smem:[#allocation46_spill]]  ;;  %s49_s10 = sadd.s32 1, %s2938_s28 }
  0x42   : > { %p67_p6 = scmp.eq.s32.totalorder %s2946_s30, 0  ;;  %p3142_p8 = scmp.ge.s32.totalorder %s49_s10, 2 }
  0x43   : > { %s85_s16 = sadd.s32 1, %s2914_s22  ;;  %p92_p11 = scmp.ne.s32.totalorder %s2914_s22, %s2910_s21 }
  0x44   : > { %p2394_p12 = scmp.lt.s32.totalorder %s2946_s30, 4  ;;  %s3930_s10 = smov (%p3142_p8, %s49_s10), 0 }
  0x45   : > { %3872 = sst [smem:[#allocation37_spill]] %s3930_s10  ;;  %p94_p0 = por %p92_p11, %p67_p6 }
  0x46   : > { %s3874_s1 = sld [smem:[#allocation40_spill]] }
  0x47   : > { %2366 = dma.hbm_to_vmem [thread:$0]  (!%p2364_p2), %s3870_s7, 2048, %s385_s8, [#allocation9], %s3818_s20, %s3818_s20, %s2950_s11  }
  0x48   : > { %s3159_s8 = ssub.s32 %s2938_s28, %s3930_s10  ;;  %s421_s11 = sand.u32 1, %s2914_s22  }
  0x49   : > { %p83_p2 = scmp.eq.s32.totalorder %s3159_s8, 0  ;;  %s3163_s13 = sshll.u32 %s421_s11, 7 }
  0x4a   : > { %s3166_s20 = sshll.u32 %s2938_s28, 6  ;;  %s423_s2 = scalar_lea.vmem [#allocation5], %s3163_s13 }
  0x4b   : > { %s3169_s7 = scalar_select %p83_p2, %s2914_s22, %s85_s16  }
  0x4c   : > { %s428_s4 = scalar_lea.hbm %s3874_s1, %s3166_s20  ;;  %s429_s18 = sshll.u32 %s423_s2, 4  ;;  %s430_s18 = int_to_ptr.vmem [resolvable:$true] %s429_s18 }
  0x4d   : > { %3873 = sst [smem:[#allocation38_spill]] %s3169_s7  ;;  %p3178_p3 = pnand %p2394_p12, %p94_p0 }
  0x4e   : > { %s3876_s11 = sand.u32 1, %s2946_s30   ;;  %s2605_s16 = scalar_lea.vmem %s430_s18, 2048 }
  0x4f   : > { %s3184_s10 = scalar_lea.sflag [#allocation6], %s3876_s11  ;;  %p3838_p5 = pneg %p3178_p3 }
  0x50   : > { %p2606_p7 = scmp.ne.s32.totalorder %s430_s18, %s2605_s16  ;;  %s2951_s2 = smov [#allocation5]  }
  0x51   : > { %s2610_s6 = sshll.u32 %s2951_s2, 4  ;;  %s2611_s6 = int_to_ptr.vmem [resolvable:$false] %s2610_s6 }
  0x52   : > { %p2608_p9 = pnand %p2606_p7, %p3838_p5  ;;  %s2612_s27 = scalar_lea.vmem %s2611_s6, 4096 }
  0x53   : > { %p2613_p11 = scmp.lt.s32.totalorder %s430_s18, %s2611_s6  ;;  %p2614_p0 = scmp.lt.s32.totalorder %s2612_s27, %s2605_s16 }
  0x54   : > { %p2609_p10 = pneg %p2608_p9 }
  0x55   : > { %p2615_p2 = por %p2614_p0, %p2613_p11 }
  0x57   : > { %p2616_p1 = pnand %p2615_p2, %p2609_p10 }
  0x59   : > { %2619 = shalt.err (!%p2616_p1)
}
  0x5a   : > { %s3825_s1 = smov 64   ;;  %s3827_s11 = smov 4  }
  0x5b   : > { %s3877_s16 = smov 128   ;;  %s59_s2 = sadd.s32 1, %s2926_s25 }
  0x5c   : > { %2373 = dma.hbm_to_vmem [thread:$0]  (!%p3178_p3), %s428_s4, 2048, %s430_s18, %s3184_s10, %s3877_s16, %s3825_s1, %s3827_s11  }
  0x5d   : > { %s52_s6 = sadd.s32 1, %s2942_s29  ;;  %p66_p1 = scmp.ne.s32.totalorder %s2926_s25, %s2922_s24 }
  0x5e   : > { %s3932_s6 = smov (!%p3142_p8, %s52_s6), %s2942_s29  ;;  %s264_s28 = sadd.s32 1, %s2902_s19 }
  0x5f   : > { %p3206_p7 = por %p67_p6, %p66_p1  ;;  %p54_p9 = scmp.ge.s32.totalorder %s3932_s6, 2 }
  0x60   : > { %s398_s7 = sand.u32 1, %s2926_s25   ;;  %s2062_s4 = sshll.u32 %s2942_s29, 12 }
  0x61   : > { %s1974_s22 = sshll.u32 %s398_s7, 8  ;;  %s3934_s6 = smov (%p54_p9, %s3932_s6), 0 }
  0x62   : > { %s56_s18 = ssub.s32 %s2942_s29, %s3934_s6  ;;  %s3879_s0 = sld [smem:[#allocation39_spill]] }
  0x63   : > { %p57_p6 = scmp.eq.s32.totalorder %s56_s18, 0  ;;  %s261_s26 = sor.u32 %s3159_s8, %s56_s18 }
  0x64   : > { %p262_p8 = scmp.eq.s32.totalorder %s261_s26, 0  ;;  %s402_s15 = scalar_lea.vmem [#allocation2], %s1974_s22 }
  0x65   : > { %s409_s21 = sshll.u32 %s402_s15, 4  ;;  %p3233_p10 = pnand %p2394_p12, %p3206_p7  ;;  %s410_s21 = int_to_ptr.vmem [resolvable:$true] %s409_s21 }
  0x66   : > { %s3224_s12 = scalar_select %p57_p6, %s2926_s25, %s59_s2  }
  0x67   : > { %s3227_s14 = scalar_select %p262_p8, %s2902_s19, %s264_s28  }
  0x68   : > { %s3220_s11 = scalar_lea.hbm %s3879_s0, %s2062_s4  ;;  %s399_s1 = scalar_lea.sflag [#allocation3], %s398_s7 }
  0x69   : > { %p2622_p11 = pneg %p3233_p10  ;;  %s2633_s4 = scalar_lea.vmem %s410_s21, 4096 }
  0x6a   : > { %p2634_p0 = scmp.ne.s32.totalorder %s410_s21, %s2633_s4  ;;  %s2954_s22 = smov [#allocation2]  }
  0x6b   : > { %s2638_s26 = sshll.u32 %s2954_s22, 4  ;;  %s2639_s26 = int_to_ptr.vmem [resolvable:$false] %s2638_s26 }
  0x6c   : > { %p2636_p2 = pnand %p2634_p0, %p2622_p11  ;;  %s2640_s28 = scalar_lea.vmem %s2639_s26, 8192 }
  0x6d   : > { %p2641_p9 = scmp.lt.s32.totalorder %s410_s21, %s2639_s26  ;;  %p2642_p6 = scmp.lt.s32.totalorder %s2640_s28, %s2633_s4 }
  0x6e   : > { %p2637_p1 = pneg %p2636_p2 }
  0x6f   : > { %p2643_p8 = por %p2642_p6, %p2641_p9 }
  0x71   : > { %p2644_p5 = pnand %p2643_p8, %p2637_p1 }
  0x73   : > { %2647 = shalt.err (!%p2644_p5)
}
  0x74   : > { %s2955_s15 = smov 256   ;;  %s2956_s7 = smov 16  }
  0x75   : > { %2370 = dma.hbm_to_vmem [thread:$0]  (!%p3233_p10), %s3220_s11, 4096, %s410_s21, %s399_s1, %s2955_s15, %s2955_s15, %s2956_s7  }
  0x76   : > { %s3881_s3 = sld [smem:[#allocation42_spill]]  ;;  %s449_s18 = scalar_lea.vmem [#allocation7], %s3163_s13 }
  0x77   : > { %s455_s9 = sshll.u32 %s449_s18, 4  ;;  %p3882_p5 = pneg %p3178_p3  ;;  %s456_s9 = int_to_ptr.vmem [resolvable:$true] %s455_s9 }
  0x78   : > { %s2661_s4 = scalar_lea.vmem %s456_s9, 2048  ;;  %s2957_s22 = smov [#allocation7]  }
  0x79   : > { %p2662_p12 = scmp.ne.s32.totalorder %s456_s9, %s2661_s4  ;;  %s2666_s26 = sshll.u32 %s2957_s22, 4  ;;  %s2667_s26 = int_to_ptr.vmem [resolvable:$false] %s2666_s26 }
  0x7a   : > { %s2668_s28 = scalar_lea.vmem %s2667_s26, 4096  ;;  %p2669_p0 = scmp.lt.s32.totalorder %s456_s9, %s2667_s26 }
  0x7b   : > { %p2664_p7 = pnand %p2662_p12, %p3882_p5  ;;  %p2670_p2 = scmp.lt.s32.totalorder %s2668_s28, %s2661_s4 }
  0x7c   : > { %s454_s27 = scalar_lea.hbm %s3881_s3, %s3166_s20 }
  0x7d   : > { %p2665_p11 = pneg %p2664_p7  ;;  %p2671_p10 = por %p2670_p2, %p2669_p0 }
  0x7f   : > { %p2672_p1 = pnand %p2671_p10, %p2665_p11 }
  0x81   : > { %2675 = shalt.err (!%p2672_p1)
}
  0x82   : > { %s3883_s21 = smov 4   ;;  %s3884_s24 = smov 64  }
  0x83   : > { %2376 = dma.hbm_to_vmem [thread:$0]  (!%p3178_p3), %s454_s27, 2048, %s456_s9, %s3184_s10, %s3877_s16, %s3884_s24, %s3883_s21  }
  0x84   : > { %s3885_s5 = sld [smem:[#allocation44_spill]]  ;;  %s475_s7 = scalar_lea.vmem [#allocation8], %s3163_s13 }
  0x85   : > { %s481_s8 = sshll.u32 %s475_s7, 4  ;;  %s3886_s2 = sand.u32 1, %s2946_s30   ;;  %s482_s8 = int_to_ptr.vmem [resolvable:$true] %s481_s8 }
  0x86   : > { %s472_s18 = scalar_lea.sflag [#allocation9], %s3886_s2  ;;  %s2689_s4 = scalar_lea.vmem %s482_s8, 2048 }
  0x87   : > { %p2690_p9 = scmp.ne.s32.totalorder %s482_s8, %s2689_s4  ;;  %p3887_p6 = pmov %p3882_p5 }
  0x88   : > { %s2958_s22 = smov [#allocation8]  }
  0x89   : > { %p2692_p8 = pnand %p2690_p9, %p3887_p6  ;;  %s2694_s26 = sshll.u32 %s2958_s22, 4  ;;  %s2695_s26 = int_to_ptr.vmem [resolvable:$false] %s2694_s26 }
  0x8a   : > { %s480_s15 = scalar_lea.hbm %s3885_s5, %s3166_s20  ;;  %s2696_s28 = scalar_lea.vmem %s2695_s26, 4096 }
  0x8b   : > { %p2693_p12 = pneg %p2692_p8  ;;  %p2697_p5 = scmp.lt.s32.totalorder %s482_s8, %s2695_s26 }
  0x8c   : > { %p2698_p7 = scmp.lt.s32.totalorder %s2696_s28, %s2689_s4 }
  0x8e   : > { %p2699_p11 = por %p2698_p7, %p2697_p5 }
  0x90   : > { %p2700_p0 = pnand %p2699_p11, %p2693_p12 }
  0x92   : > { %2703 = shalt.err (!%p2700_p0)
}
  0x93   : > { %2379 = dma.hbm_to_vmem [thread:$0]  (!%p3178_p3), %s480_s15, 2048, %s482_s8, %s472_s18, %s3877_s16, %s3884_s24, %s3883_s21  }
  0x94   : > { %499 = sbr.rel (%p3127_p13) target bundleno = 675 (0x2a3), region = 52  ;;  %s3888_s10 = sld [smem:[#allocation28_spill]] (!%p3127_p13) }
  0x9a   : > { %s501_s13 = sand.u32 1, %s3888_s10  }
  0x9b   : > { %s1984_s27 = sshll.u32 %s501_s13, 8  ;;  %s502_s9 = scalar_lea.sflag [#allocation3], %s501_s13 }
  0x9c   : > { %s3274_s11 = scalar_lea.vmem [#allocation2], %s1984_s27 }
  0x9d   : > { %2865 = dma.done.wait (%p3102_p4), %s502_s9, 4096  }
  0x9e   : > { %2867 = vsyncadd (%p3102_p4), %s502_s9, 4294963200  ;;  %s3890_s17 = sld [smem:[#allocation32_spill]] }
  0x9f   : > { %s3891_s1 = sld [smem:[#allocation26_spill]] }
  0xa0   : > { %s3892_s7 = sld [smem:[#allocation34_spill]] }
  0xa4   : > { %s3281_s2 = sand.u32 1, %s3890_s17  }
  0xa5   : > { %s512_s23 = sand.u32 1, %s3891_s1   ;;  %s511_s21 = scalar_lea.sflag [#allocation6], %s3281_s2 }
  0xa6   : > { %s1985_s16 = sshll.u32 %s512_s23, 7  ;;  %p3893_p13 = scmp.ne.s32.totalorder %s3892_s7, 0 }
  0xa7   : > { %s3285_s24 = scalar_lea.vmem [#allocation5], %s1985_s16 }
  0xa8   : > { %2869 = dma.done.wait (%p3893_p13), %s511_s21, 4096  }
  0xa9   : > { %2871 = vsyncadd (%p3893_p13), %s511_s21, 4294963200  ;;  %s3291_s15 = scalar_lea.vmem [#allocation7], %s1985_s16  ;;  %s529_s8 = scalar_lea.sflag [#allocation9], %s3281_s2 }
  0xaa   : > { %s3294_s18 = scalar_lea.vmem [#allocation8], %s1985_s16 }
  0xab   : > { %2873 = dma.done.wait (%p3893_p13), %s529_s8, 2048  }
  0xac   : > { %2875 = vsyncadd (%p3893_p13), %s529_s8, 4294965248  ;;  %p3894_p4 = scmp.eq.s32.totalorder %s3890_s17, 0 }
  0xae   : > { %2877 = dma.done.wait (%p3894_p4), [#allocation9], 2048   ;;  %p3895_p3 = pmov %p3894_p4 }
  0xaf   : > { %v2518_v0 = vld [vmem:[%s3285_s24 + $0x78] sm:$0xff]   ;;  %v2520_v2 = vld [vmem:[%s3285_s24 + $0x70] sm:$0xff]   ;;  %v2522_v4 = vld [vmem:[%s3285_s24 + $0x68] sm:$0xff]   ;;  %s3896_s4 = sld [smem:[#allocation29_spill]] }
  0xb0   : > { %2879 = vsyncadd (%p3895_p3), [#allocation9], 4294965248  ;;  %v2519_v1 = vld [vmem:[%s3285_s24 + $0x38] sm:$0xff]   ;;  %2063 = vmatprep.subr.bf16.mxu0 %v2518_v0  ;;  %v2521_v3 = vld [vmem:[%s3285_s24 + $0x30] sm:$0xff]   ;;  %s3897_s22 = sld [smem:[#allocation25_spill]] }
  0xb1   : > { %2064 = vmatpush3.bf16.msra.mxu0 %v2519_v1  ;;  %v2523_v5 = vld [vmem:[%s3285_s24 + $0x28] sm:$0xff]   ;;  %v2524_v6 = vld [vmem:[%s3285_s24 + $0x60] sm:$0xff]   ;;  %v2526_v8 = vld [vmem:[%s3285_s24 + $0x58] sm:$0xff]   ;;  %s3898_s13 = sld [smem:[#allocation41_spill]] }
  0xb2   : > { %2065 = vmatprep.subr.bf16.mxu0 %v2520_v2  ;;  %v2525_v7 = vld [vmem:[%s3285_s24 + $0x20] sm:$0xff]   ;;  %v2527_v9 = vld [vmem:[%s3285_s24 + $0x18] sm:$0xff]   ;;  %v2528_v10 = vld [vmem:[%s3285_s24 + $0x50] sm:$0xff]   ;;  %s3899_s7 = sld [smem:[#allocation43_spill]] }
  0xb3   : > { %v625_v11 = vld [vmem:[%s3274_s11 + $0x8] sm:$0xff]  ;;  %v627_v12 = vld [vmem:[%s3274_s11 + $0x18] sm:$0xff]  ;;  %v2529_v14 = vld [vmem:[%s3285_s24 + $0x10] sm:$0xff]   ;;  %s3905_s0 = sld [smem:[#allocation49_spill]] }
  0xb4   : > { %v3317_v13 = vpack.c.bf16 %v627_v12, %v625_v11  ;;  %v2530_v15 = vld [vmem:[%s3285_s24 + $0x48] sm:$0xff]   ;;  %v2532_v17 = vld [vmem:[%s3285_s24 + $0x40] sm:$0xff]   ;;  %v626_v20 = vld [vmem:[%s3274_s11 + $0x10] sm:$0xff] }
  0xb5   : > { %2066 = vmatpush3.bf16.msra.mxu0 %v2521_v3  ;;  %v2531_v16 = vld [vmem:[%s3285_s24 + $0x8] sm:$0xff]   ;;  %v2533_v18 = vld [vmem:[%s3285_s24] sm:$0xff]   ;;  %v631_v22 = vld [vmem:[%s3274_s11 + $0x38] sm:$0xff]  ;;  %p614_p2 = scmp.lt.s32.totalorder %s3896_s4, 1  ;;  %s2048_s10 = sshll.u32 %s3896_s4, 4 }
  0xb6   : > { %2067 = vmatprep.subr.bf16.mxu0 %v2522_v4  ;;  %839 = vmatprep.mubr.bf16.mxu0 %v3317_v13  ;;  %v624_v19 = vld [vmem:[%s3274_s11] sm:$0xff]  ;;  %v629_v21 = vld [vmem:[%s3274_s11 + $0x28] sm:$0xff]  ;;  %v2534_v23 = vld [vmem:[%s3291_s15 + $0x78] sm:$0xff]   ;;  %s3459_s28 = sand.u32 1, %s3897_s22   ;;  %s3901_s22 = sld [smem:[#allocation30_spill]] }
  0xb7   : > { %1071 = vmatprep.mubr.bf16.mxu1 %v3317_v13  ;;  %v2535_v24 = vld [vmem:[%s3291_s15 + $0x38] sm:$0xff]   ;;  %2127 = vmatprep.subr.bf16.mxu1 %v2534_v23  ;;  %v2536_v25 = vld [vmem:[%s3291_s15 + $0x70] sm:$0xff]   ;;  %v3333_v26 = vpack.c.bf16 %v626_v20, %v624_v19  ;;  %v3336_v28 = vpack.c.bf16 %v631_v22, %v629_v21  ;;  %v2538_v29 = vld [vmem:[%s3291_s15 + $0x68] sm:$0xff]   ;;  %s3456_s26 = scalar_select %p614_p2, %s3896_s4, 1 }
  0xb8   : > { %2128 = vmatpush3.bf16.msra.mxu1 %v2535_v24  ;;  %v2537_v27 = vld [vmem:[%s3291_s15 + $0x30] sm:$0xff]   ;;  %v628_v30 = vld [vmem:[%s3274_s11 + $0x20] sm:$0xff]  ;;  %v633_v32 = vld [vmem:[%s3274_s11 + $0x48] sm:$0xff]  ;;  %s3466_s9 = sshll.u32 %s3459_s28, 7 }
  0xb9   : > { %2068 = vmatpush3.bf16.msra.mxu0 %v2523_v5  ;;  %2129 = vmatprep.subr.bf16.mxu1 %v2536_v25  ;;  %v630_v31 = vld [vmem:[%s3274_s11 + $0x30] sm:$0xff]  ;;  %v2539_v33 = vld [vmem:[%s3291_s15 + $0x28] sm:$0xff]   ;;  %v2540_v34 = vld [vmem:[%s3291_s15 + $0x60] sm:$0xff]   ;;  %s616_s27 = scalar_lea.vmem %s3898_s13, %s3456_s26  ;;  %s619_s23 = scalar_lea.vmem %s3899_s7, %s3456_s26 }
  0xba   : > { %2069 = vmatprep.subr.bf16.mxu0 %v2524_v6  ;;  %v635_v35 = vld [vmem:[%s3274_s11 + $0x58] sm:$0xff]  ;;  %v2541_v36 = vld [vmem:[%s3291_s15 + $0x20] sm:$0xff]   ;;  %v3348_v37 = vpack.c.bf16 %v630_v31, %v628_v30  ;;  %v634_v42 = vld [vmem:[%s3274_s11 + $0x50] sm:$0xff]  ;;  %s3496_s16 = scalar_lea.vmem [#allocation12], %s3466_s9 }
  0xbb   : > { %v2542_v38 = vld [vmem:[%s3291_s15 + $0x58] sm:$0xff]   ;;  %v3351_v39 = vpack.c.bf16 %v635_v35, %v633_v32  ;;  %v632_v41 = vld [vmem:[%s3274_s11 + $0x40] sm:$0xff]  ;;  %v637_v44 = vld [vmem:[%s3274_s11 + $0x68] sm:$0xff]  ;;  %s1642_s17 = sshll.u32 %s3496_s16, 4  ;;  %s3598_s17 = int_to_ptr.vmem [resolvable:$true] %s1642_s17 }
  0xbc   : > { %2130 = vmatpush3.bf16.msra.mxu1 %v2537_v27  ;;  %v2546_v40 = vld [vmem:[%s3294_s18 + $0x78] sm:$0xff]   ;;  %v2544_v46 = vld [vmem:[%s3291_s15 + $0x50] sm:$0xff]   ;;  %v3364_v49 = vpack.c.bf16 %v634_v42, %v632_v41  ;;  %v2547_v53 = vld [vmem:[%s3291_s15 + $0x48] sm:$0xff]   ;;  %s2049_s20 = sshll.u32 %s3901_s22, 5  ;;  %s3839_s22 = scalar_lea.sflag [#allocation13], %s3281_s2 }
  0xbd   : > { %2070 = vmatpush3.bf16.msra.mxu0 %v2525_v7  ;;  %2131 = vmatprep.subr.bf16.mxu1 %v2538_v29  ;;  %v2548_v43 = vld [vmem:[%s3294_s18 + $0x38] sm:$0xff]   ;;  %v2552_v48 = vld [vmem:[%s3294_s18 + $0x70] sm:$0xff]   ;;  %v2554_v54 = vld [vmem:[%s3294_s18 + $0x68] sm:$0xff]   ;;  %s1621_s13 = sadd.s32 %s2049_s20, %s2048_s10  ;;  %s2704_s10 = scalar_lea.vmem %s3598_s17, 2048 }
  0xbe   : > { %2071 = vmatprep.subr.bf16.mxu0 %v2526_v8  ;;  %v2543_v45 = vld [vmem:[%s3291_s15 + $0x18] sm:$0xff]   ;;  %v2545_v50 = vld [vmem:[%s3291_s15 + $0x10] sm:$0xff]   ;;  %v636_v55 = vld [vmem:[%s3274_s11 + $0x60] sm:$0xff]  ;;  %p2705_p10 = scmp.ne.s32.totalorder %s3598_s17, %s2704_s10 }
  0xbf   : > { %v639_v47 = vld [vmem:[%s3274_s11 + $0x78] sm:$0xff]  ;;  %v2553_v51 = vld [vmem:[%s3294_s18 + $0x30] sm:$0xff]   ;;  %v2549_v57 = vld [vmem:[%s3291_s15 + $0x8] sm:$0xff]  }
  0xc0   : > { %2132 = vmatpush3.bf16.msra.mxu1 %v2539_v33  ;;  %v3368_v52 = vpack.c.bf16 %v639_v47, %v637_v44  ;;  %v638_v56 = vld [vmem:[%s3274_s11 + $0x70] sm:$0xff]  ;;  %v2555_v58 = vld [vmem:[%s3294_s18 + $0x28] sm:$0xff]   ;;  %v2556_v59 = vld [vmem:[%s3294_s18 + $0x60] sm:$0xff]  }
  0xc1   : > { %2072 = vmatpush3.bf16.msra.mxu0 %v2527_v9  ;;  %2133 = vmatprep.subr.bf16.mxu1 %v2540_v34  ;;  %v2550_v60 = vld [vmem:[%s3291_s15 + $0x40] sm:$0xff]   ;;  %v641_v61 = vld [vmem:[%s3274_s11 + $0x88] sm:$0xff]  ;;  %v643_v62 = vld [vmem:[%s3274_s11 + $0x98] sm:$0xff]  ;;  %v3383_v0 = vpack.c.bf16 %v638_v56, %v636_v55 }
  0xc2   : > { %2073 = vmatprep.subr.bf16.mxu0 %v2528_v10  ;;  %v2557_v63 = vld [vmem:[%s3294_s18 + $0x20] sm:$0xff]   ;;  %v3386_v2 = vpack.c.bf16 %v643_v62, %v641_v61  ;;  %v1383_v3 = vld [vmem:[#allocation10 + $0x78] sm:$0xff]  ;;  %v642_v6 = vld [vmem:[%s3274_s11 + $0x90] sm:$0xff] }
  0xc3   : > { %v2551_v1 = vld [vmem:[%s3291_s15] sm:$0xff]   ;;  %v2558_v4 = vld [vmem:[%s3294_s18 + $0x58] sm:$0xff]   ;;  %v645_v8 = vld [vmem:[%s3274_s11 + $0xa8] sm:$0xff]  ;;  %s3900_s15 = sld [smem:[#allocation45_spill]] }
  0xc4   : > { %2134 = vmatpush3.bf16.msra.mxu1 %v2541_v36  ;;  %v640_v5 = vld [vmem:[%s3274_s11 + $0x80] sm:$0xff]  ;;  %v2559_v7 = vld [vmem:[%s3294_s18 + $0x18] sm:$0xff]   ;;  %v2560_v9 = vld [vmem:[%s3294_s18 + $0x50] sm:$0xff]  }
  0xc5   : > { %2074 = vmatpush3.bf16.msra.mxu0 %v2529_v14  ;;  %2135 = vmatprep.subr.bf16.mxu1 %v2542_v38  ;;  %v647_v10 = vld [vmem:[%s3274_s11 + $0xb8] sm:$0xff]  ;;  %v1382_v11 = vld [vmem:[#allocation10 + $0x70] sm:$0xff]  ;;  %v3399_v14 = vpack.c.bf16 %v642_v6, %v640_v5  ;;  %v644_v19 = vld [vmem:[%s3274_s11 + $0xa0] sm:$0xff] }
  0xc6   : > { %2075 = vmatprep.subr.bf16.mxu0 %v2530_v15  ;;  %v2561_v12 = vld [vmem:[%s3294_s18 + $0x10] sm:$0xff]   ;;  %v3402_v15 = vpack.c.bf16 %v647_v10, %v645_v8  ;;  %v2564_v21 = vld [vmem:[%s3294_s18 + $0x40] sm:$0xff]   ;;  %v649_v22 = vld [vmem:[%s3274_s11 + $0xc8] sm:$0xff] }
  0xc7   : > { %v646_v20 = vld [vmem:[%s3274_s11 + $0xb0] sm:$0xff]  ;;  %v651_v23 = vld [vmem:[%s3274_s11 + $0xd8] sm:$0xff]  ;;  %v1380_v24 = vld [vmem:[#allocation10 + $0x60] sm:$0xff] }
  0xc8   : > { %2136 = vmatpush3.bf16.msra.mxu1 %v2543_v45  ;;  %v2565_v25 = vld [vmem:[%s3294_s18] sm:$0xff]   ;;  %v3415_v27 = vpack.c.bf16 %v646_v20, %v644_v19  ;;  %v3418_v29 = vpack.c.bf16 %v651_v23, %v649_v22  ;;  %v1379_v30 = vld [vmem:[#allocation10 + $0x58] sm:$0xff]  ;;  %v650_v32 = vld [vmem:[%s3274_s11 + $0xd0] sm:$0xff] }
  0xc9   : > { %2076 = vmatpush3.bf16.msra.mxu0 %v2531_v16  ;;  %2137 = vmatprep.subr.bf16.mxu1 %v2544_v46  ;;  %v1381_v16 = vld [vmem:[#allocation10 + $0x68] sm:$0xff]  ;;  %v648_v31 = vld [vmem:[%s3274_s11 + $0xc0] sm:$0xff]  ;;  %v655_v34 = vld [vmem:[%s3274_s11 + $0xf8] sm:$0xff]  ;;  %s622_s8 = scalar_lea.vmem %s3900_s15, %s3456_s26  ;;  %s3902_s26 = sld [smem:[#allocation35_spill]] }
  0xca   : > { %2077 = vmatprep.subr.bf16.mxu0 %v2532_v17  ;;  %v2562_v17 = vld [vmem:[%s3294_s18 + $0x48] sm:$0xff]   ;;  %v1378_v35 = vld [vmem:[#allocation10 + $0x50] sm:$0xff]  ;;  %v3427_v36 = vpack.c.bf16 %v650_v32, %v648_v31  ;;  %v652_v41 = vld [vmem:[%s3274_s11 + $0xe0] sm:$0xff] }
  0xcb   : > { %v653_v33 = vld [vmem:[%s3274_s11 + $0xe8] sm:$0xff]  ;;  %v654_v42 = vld [vmem:[%s3274_s11 + $0xf0] sm:$0xff]  ;;  %v1375_v45 = vld [vmem:[#allocation10 + $0x38] sm:$0xff]  ;;  %s3472_s11 = scalar_lea.vmem [#allocation11], %s3466_s9 }
  0xcc   : > { %2138 = vmatpush3.bf16.msra.mxu1 %v2545_v50  ;;  %v671_v38 = vpack.c.bf16 %v655_v34, %v653_v33  ;;  %v670_v44 = vpack.c.bf16 %v654_v42, %v652_v41  ;;  %v1374_v46 = vld [vmem:[#allocation10 + $0x30] sm:$0xff]  ;;  %v1373_v47 = vld [vmem:[#allocation10 + $0x28] sm:$0xff] }
  0xcd   : > { %2078 = vmatpush3.bf16.msra.mxu0 %v2533_v18  ;;  %2139 = vmatprep.subr.bf16.mxu1 %v2547_v53  ;;  %v2563_v18 = vld [vmem:[%s3294_s18 + $0x8] sm:$0xff]   ;;  %v1370_v50 = vld [vmem:[#allocation10 + $0x10] sm:$0xff]  ;;  %s3542_s18 = scalar_lea.vmem [#allocation14], %s3466_s9 }
  0xce   : > { %2191 = vmatprep.subr.bf16.mxu0 %v2546_v40  ;;  %v1377_v40 = vld [vmem:[#allocation10 + $0x48] sm:$0xff] }
  0xcf   : > { %p3906_p1 = scmp.ne.s32.totalorder %s3902_s26, 0 }
  0xd0   : > { %840 = vmatmul.mubr.bf16.vlgmr.msra.gmra.mxu0 %v3333_v26  ;;  %2140 = vmatpush3.bf16.msra.mxu1 %v2549_v57 }
  0xd1   : > { %847 = vmatprep.mubr.bf16.mxu0 %v3336_v28  ;;  %2192 = vmatpush3.bf16.msra.mxu0 %v2548_v43  ;;  %v1376_v43 = vld [vmem:[#allocation10 + $0x40] sm:$0xff]  ;;  %p2706_p9 = pnand %p2705_p10, %p3906_p1 }
  0xd2   : > { %2193 = vmatprep.subr.bf16.mxu0 %v2552_v48  ;;  %2141 = vmatprep.subr.bf16.mxu1 %v2550_v60  ;;  %v1372_v48 = vld [vmem:[#allocation10 + $0x20] sm:$0xff] }
  0xd3   : > { %p2707_p6 = pneg %p2706_p9 }
  0xd4   : > { %2142 = vmatpush3.bf16.msra.mxu1 %v2551_v1 }
  0xd5   : > { %2194 = vmatpush3.bf16.msra.mxu0 %v2553_v51  ;;  %2287 = vmatprep.subr.mxu1 %v1383_v3 }
  0xd6   : > { %2195 = vmatprep.subr.bf16.mxu0 %v2554_v54 }
  0xd7   : > { %1072 = vmatmul.mubr.bf16.vlgmr.msra.gmra.mxu1 %v3333_v26 }
  0xd8   : > { %848 = vmatmul.mubr.bf16.gmra.mxu0 %v3348_v37  ;;  %2288 = vmatpush3.xpose.msra.mxu1 %v1383_v3 }
  0xd9   : > { %855 = vmatprep.mubr.bf16.mxu0 %v3351_v39  ;;  %2196 = vmatpush3.bf16.msra.mxu0 %v2555_v58 }
  0xda   : > { %2197 = vmatprep.subr.bf16.mxu0 %v2556_v59  ;;  %1079 = vmatprep.mubr.bf16.mxu1 %v3336_v28 }
  0xdb   : > { %2289 = vmatprep.subr.mxu1 %v1382_v11 }
  0xdc   : > { %2290 = vmatpush3.xpose.msra.mxu1 %v1382_v11 }
  0xdd   : > { %2198 = vmatpush3.bf16.msra.mxu0 %v2557_v63  ;;  %2291 = vmatprep.subr.mxu1 %v1381_v16 }
  0xde   : > { %2199 = vmatprep.subr.bf16.mxu0 %v2558_v4 }
  0xdf   : > { %1080 = vmatmul.mubr.bf16.gmra.mxu1 %v3348_v37 }
  0xe0   : > { %856 = vmatmul.mubr.bf16.gmra.mxu0 %v3364_v49  ;;  %2292 = vmatpush3.xpose.msra.mxu1 %v1381_v16  ;;  %v3490_v16 = vld [vmem:[%s619_s23] ss:$0 sm:$0xff]  ;;  %s3903_s23 = sld [smem:[#allocation48_spill]] }
  0xe1   : > { %863 = vmatprep.mubr.bf16.mxu0 %v3368_v52  ;;  %2200 = vmatpush3.bf16.msra.mxu0 %v2559_v7 }
  0xe2   : > { %2201 = vmatprep.subr.bf16.mxu0 %v2560_v9  ;;  %1087 = vmatprep.mubr.bf16.mxu1 %v3351_v39 }
  0xe3   : > { %2293 = vmatprep.subr.mxu1 %v1380_v24 }
  0xe4   : > { %2294 = vmatpush3.xpose.msra.mxu1 %v1380_v24 }
  0xe5   : > { %2202 = vmatpush3.bf16.msra.mxu0 %v2561_v12  ;;  %2295 = vmatprep.subr.mxu1 %v1379_v30 }
  0xe6   : > { %2203 = vmatprep.subr.bf16.mxu0 %v2562_v17  ;;  %s3904_s15 = smov %s3903_s23 }
  0xe7   : > { %1088 = vmatmul.mubr.bf16.gmra.mxu1 %v3364_v49 }
  0xe8   : > { %864 = vmatmul.mubr.bf16.gmra.mxu0 %v3383_v0  ;;  %2296 = vmatpush3.xpose.msra.mxu1 %v1379_v30 }
  0xe9   : > { %871 = vmatprep.mubr.bf16.mxu0 %v3386_v2  ;;  %2204 = vmatpush3.bf16.msra.mxu0 %v2563_v18 }
  0xea   : > { %2205 = vmatprep.subr.bf16.mxu0 %v2564_v21  ;;  %1095 = vmatprep.mubr.bf16.mxu1 %v3368_v52 }
  0xeb   : > { %2297 = vmatprep.subr.mxu1 %v1378_v35 }
  0xec   : > { %2298 = vmatpush3.xpose.msra.mxu1 %v1378_v35 }
  0xed   : > { %2206 = vmatpush3.bf16.msra.mxu0 %v2565_v25  ;;  %2299 = vmatprep.subr.mxu1 %v1377_v40 }
  0xef   : > { %1096 = vmatmul.mubr.bf16.gmra.mxu1 %v3383_v0 }
  0xf0   : > { %872 = vmatmul.mubr.bf16.gmra.mxu0 %v3399_v14  ;;  %2300 = vmatpush3.xpose.msra.mxu1 %v1377_v40 }
  0xf1   : > { %879 = vmatprep.mubr.bf16.mxu0 %v3402_v15  ;;  %1103 = vmatprep.mubr.bf16.mxu1 %v3386_v2 }
  0xf2   : > { %2301 = vmatprep.subr.mxu1 %v1376_v43 }
  0xf4   : > { %2302 = vmatpush3.xpose.msra.mxu1 %v1376_v43 }
  0xf5   : > { %2303 = vmatprep.subr.mxu1 %v1375_v45 }
  0xf7   : > { %1104 = vmatmul.mubr.bf16.gmra.mxu1 %v3399_v14 }
  0xf8   : > { %880 = vmatmul.mubr.bf16.gmra.mxu0 %v3415_v27  ;;  %2304 = vmatpush3.xpose.msra.mxu1 %v1375_v45 }
  0xf9   : > { %887 = vmatprep.mubr.bf16.mxu0 %v3418_v29  ;;  %1111 = vmatprep.mubr.bf16.mxu1 %v3402_v15 }
  0xfa   : > { %2305 = vmatprep.subr.mxu1 %v1374_v46 }
  0xfc   : > { %2306 = vmatpush3.xpose.msra.mxu1 %v1374_v46 }
  0xfd   : > { %2307 = vmatprep.subr.mxu1 %v1373_v47 }
  0xff   : > { %1112 = vmatmul.mubr.bf16.gmra.mxu1 %v3415_v27 }
 0x100   : > { %888 = vmatmul.mubr.bf16.gmra.mxu0 %v3427_v36  ;;  %2308 = vmatpush3.xpose.msra.mxu1 %v1373_v47 }
 0x101   : > { %895 = vmatprep.mubr.bf16.mxu0 %v671_v38  ;;  %1119 = vmatprep.mubr.bf16.mxu1 %v3418_v29 }
 0x102   : > { %2309 = vmatprep.subr.mxu1 %v1372_v48 }
 0x104   : > { %2310 = vmatpush3.xpose.msra.mxu1 %v1372_v48 }
 0x107   : > { %1120 = vmatmul.mubr.bf16.gmra.mxu1 %v3427_v36 }
 0x108   : > { %896 = vmatmul.mubr.bf16.gmra.mxu0 %v670_v44  ;;  %1127 = vmatprep.mubr.bf16.mxu1 %v671_v38 }
 0x109   : > { %1303 = vmatprep.mubr.bf16.mxu0 %v3317_v13  ;;  %v1371_v13 = vld [vmem:[#allocation10 + $0x18] sm:$0xff] }
 0x10a   : > { %2311 = vmatprep.subr.mxu1 %v1371_v13 }
 0x10b   : > { %2312 = vmatpush3.xpose.msra.mxu1 %v1371_v13 }
 0x10c   : > { %2313 = vmatprep.subr.mxu1 %v1370_v50 }
 0x10f   : > { %2314 = vmatpush3.xpose.msra.mxu1 %v1370_v50 }
 0x110   : > { %1304 = vmatmul.mubr.bf16.vlgmr.msra.gmra.mxu0 %v3333_v26  ;;  %v1369_v26 = vld [vmem:[#allocation10 + $0x8] sm:$0xff]  ;;  %1128 = vmatmul.mubr.bf16.gmra.mxu1 %v670_v44 }
 0x111   : > { %1311 = vmatprep.mubr.bf16.mxu0 %v3336_v28  ;;  %2315 = vmatprep.subr.mxu1 %v1369_v26  ;;  %v1368_v28 = vld [vmem:[#allocation10] sm:$0xff] }
 0x113   : > { %2316 = vmatpush3.xpose.msra.mxu1 %v1369_v26 }
 0x114   : > { %2317 = vmatprep.subr.mxu1 %v1368_v28 }
 0x117   : > { %2318 = vmatpush3.xpose.msra.mxu1 %v1368_v28 }
 0x118   : > { %1312 = vmatmul.mubr.bf16.gmra.mxu0 %v3348_v37 }
 0x119   : > { %1319 = vmatprep.mubr.bf16.mxu0 %v3351_v39  ;;  %v3468_v39 = vld [vmem:[%s616_s27] ss:$0 sm:$0xff]  ;;  %s3589_s27 = sshll.u32 %s1621_s13, 7 }
 0x11a   : > { %s3596_s21 = scalar_lea.hbm %s3903_s23, %s3589_s27  ;;  %s3604_s4 = scalar_lea.hbm %s3905_s0, %s3589_s27 }
 0x120   : > { %1320 = vmatmul.mubr.bf16.gmra.mxu0 %v3364_v49 }
 0x121   : > { %1327 = vmatprep.mubr.bf16.mxu0 %v3368_v52 }
 0x128   : > { %1328 = vmatmul.mubr.bf16.gmra.mxu0 %v3383_v0 }
 0x129   : > { %1335 = vmatprep.mubr.bf16.mxu0 %v3386_v2 }
 0x130   : > { %1336 = vmatmul.mubr.bf16.gmra.mxu0 %v3399_v14 }
 0x131   : > { %1343 = vmatprep.mubr.bf16.mxu0 %v3402_v15 }
 0x138   : > { %1344 = vmatmul.mubr.bf16.gmra.mxu0 %v3415_v27 }
 0x139   : > { %1351 = vmatprep.mubr.bf16.mxu0 %v3418_v29 }
 0x140   : > { %1352 = vmatmul.mubr.bf16.gmra.mxu0 %v3427_v36 }
 0x141   : > { %1359 = vmatprep.mubr.bf16.mxu0 %v671_v38 }
 0x148   : > { %1360 = vmatmul.mubr.bf16.gmra.mxu0 %v670_v44 }
 0x190   : > { %v2079_v37 = vpop.f32.mrf.mxu0 }
 0x192   : > { %v2080_v49 = vpop.f32.mrf.mxu0 }
 0x193   : > { %v2081_v51 = vadd.f32 %v2080_v49, %v2079_v37 }
 0x194   : > { %v2082_v52 = vpop.f32.mrf.mxu0 }
 0x195   : > { %v842_v53 = vadd.f32 %v2081_v51, %v3468_v39 }
 0x196   : > { %v2083_v54 = vpop.f32.mrf.mxu0 }
 0x197   : > { %1529 = vst [vmem:[%s3472_s11] sm:$0xff] %v842_v53  ;;  %v2084_v55 = vadd.f32 %v2083_v54, %v2082_v52  ;;  %2319 = vmatprep.mubr.f32.mxu1 %v842_v53  ;;  %v2143_v12 = vpop.f32.mrf.mxu1 }
 0x198   : > { %v2085_v56 = vpop.f32.mrf.mxu0 }
 0x199   : > { %v845_v57 = vadd.f32 %v2084_v55, %v3468_v39  ;;  %v2144_v17 = vpop.f32.mrf.mxu1 }
 0x19a   : > { %v2086_v58 = vpop.f32.mrf.mxu0  ;;  %v2145_v19 = vadd.f32 %v2144_v17, %v2143_v12 }
 0x19b   : > { %1530 = vst [vmem:[%s3472_s11 + $0x8] sm:$0xff] %v845_v57  ;;  %v2087_v59 = vadd.f32 %v2086_v58, %v2085_v56  ;;  %2320 = vmatmul.mubr.f32.vlgmr.msra.gmra.mxu1 %v845_v57  ;;  %v2146_v21 = vpop.f32.mrf.mxu1 }
 0x19c   : > { %v2088_v60 = vpop.f32.mrf.mxu0  ;;  %v1074_v23 = vadd.f32 %v2145_v19, %v3490_v16 }
 0x19d   : > { %v850_v61 = vadd.f32 %v2087_v59, %v3468_v39  ;;  %v2147_v25 = vpop.f32.mrf.mxu1 }
 0x19e   : > { %v2089_v62 = vpop.f32.mrf.mxu0  ;;  %1545 = vst [vmem:[%s3496_s16] sm:$0xff] %v1074_v23  ;;  %v2148_v29 = vadd.f32 %v2147_v25, %v2146_v21 }
 0x19f   : > { %1531 = vst [vmem:[%s3472_s11 + $0x10] sm:$0xff] %v850_v61  ;;  %v2090_v63 = vadd.f32 %v2089_v62, %v2088_v60  ;;  %2322 = vmatprep.mubr.f32.mxu1 %v850_v61  ;;  %v2149_v31 = vpop.f32.mrf.mxu1 }
 0x1a0   : > { %v2091_v0 = vpop.f32.mrf.mxu0  ;;  %v1077_v33 = vadd.f32 %v2148_v29, %v3490_v16 }
 0x1a1   : > { %v853_v1 = vadd.f32 %v2090_v63, %v3468_v39  ;;  %v2150_v35 = vpop.f32.mrf.mxu1 }
 0x1a2   : > { %v2092_v2 = vpop.f32.mrf.mxu0  ;;  %1546 = vst [vmem:[%s3496_s16 + $0x8] sm:$0xff] %v1077_v33  ;;  %v2151_v38 = vadd.f32 %v2150_v35, %v2149_v31  ;;  %v3535_v31 = vld [vmem:[%s622_s8] ss:$0 sm:$0xff] }
 0x1a3   : > { %1532 = vst [vmem:[%s3472_s11 + $0x18] sm:$0xff] %v853_v1  ;;  %v2093_v3 = vadd.f32 %v2092_v2, %v2091_v0  ;;  %2323 = vmatmul.mubr.f32.gmra.mxu1 %v853_v1  ;;  %v2152_v41 = vpop.f32.mrf.mxu1 }
 0x1a4   : > { %v2094_v4 = vpop.f32.mrf.mxu0  ;;  %v1082_v43 = vadd.f32 %v2151_v38, %v3490_v16 }
 0x1a5   : > { %v858_v5 = vadd.f32 %v2093_v3, %v3468_v39  ;;  %v2153_v45 = vpop.f32.mrf.mxu1 }
 0x1a6   : > { %v2095_v6 = vpop.f32.mrf.mxu0  ;;  %1547 = vst [vmem:[%s3496_s16 + $0x10] sm:$0xff] %v1082_v43  ;;  %v2154_v47 = vadd.f32 %v2153_v45, %v2152_v41 }
 0x1a7   : > { %1533 = vst [vmem:[%s3472_s11 + $0x20] sm:$0xff] %v858_v5  ;;  %v2096_v7 = vadd.f32 %v2095_v6, %v2094_v4  ;;  %2325 = vmatprep.mubr.f32.mxu1 %v858_v5  ;;  %v2155_v13 = vpop.f32.mrf.mxu1 }
 0x1a8   : > { %v2097_v8 = vpop.f32.mrf.mxu0  ;;  %v1085_v26 = vadd.f32 %v2154_v47, %v3490_v16 }
 0x1a9   : > { %v861_v9 = vadd.f32 %v2096_v7, %v3468_v39  ;;  %v2156_v37 = vpop.f32.mrf.mxu1 }
 0x1aa   : > { %v2098_v10 = vpop.f32.mrf.mxu0  ;;  %1548 = vst [vmem:[%s3496_s16 + $0x18] sm:$0xff] %v1085_v26  ;;  %v2157_v51 = vadd.f32 %v2156_v37, %v2155_v13 }
 0x1ab   : > { %1534 = vst [vmem:[%s3472_s11 + $0x28] sm:$0xff] %v861_v9  ;;  %v2099_v11 = vadd.f32 %v2098_v10, %v2097_v8  ;;  %2326 = vmatmul.mubr.f32.gmra.mxu1 %v861_v9  ;;  %v2158_v53 = vpop.f32.mrf.mxu1 }
 0x1ac   : > { %v2100_v14 = vpop.f32.mrf.mxu0  ;;  %v1090_v55 = vadd.f32 %v2157_v51, %v3490_v16 }
 0x1ad   : > { %v866_v15 = vadd.f32 %v2099_v11, %v3468_v39  ;;  %v2159_v57 = vpop.f32.mrf.mxu1 }
 0x1ae   : > { %v2101_v18 = vpop.f32.mrf.mxu0  ;;  %1549 = vst [vmem:[%s3496_s16 + $0x20] sm:$0xff] %v1090_v55  ;;  %v2160_v59 = vadd.f32 %v2159_v57, %v2158_v53 }
 0x1af   : > { %1535 = vst [vmem:[%s3472_s11 + $0x30] sm:$0xff] %v866_v15  ;;  %v2102_v20 = vadd.f32 %v2101_v18, %v2100_v14  ;;  %2328 = vmatprep.mubr.f32.mxu1 %v866_v15  ;;  %v2161_v61 = vpop.f32.mrf.mxu1 }
 0x1b0   : > { %v2103_v22 = vpop.f32.mrf.mxu0  ;;  %v1093_v63 = vadd.f32 %v2160_v59, %v3490_v16 }
 0x1b1   : > { %v869_v24 = vadd.f32 %v2102_v20, %v3468_v39  ;;  %v2162_v1 = vpop.f32.mrf.mxu1 }
 0x1b2   : > { %v2104_v27 = vpop.f32.mrf.mxu0  ;;  %1550 = vst [vmem:[%s3496_s16 + $0x28] sm:$0xff] %v1093_v63  ;;  %v2163_v3 = vadd.f32 %v2162_v1, %v2161_v61 }
 0x1b3   : > { %1536 = vst [vmem:[%s3472_s11 + $0x38] sm:$0xff] %v869_v24  ;;  %v2105_v30 = vadd.f32 %v2104_v27, %v2103_v22  ;;  %2329 = vmatmul.mubr.f32.gmra.mxu1 %v869_v24  ;;  %v2164_v5 = vpop.f32.mrf.mxu1 }
 0x1b4   : > { %v2106_v32 = vpop.f32.mrf.mxu0  ;;  %v1098_v7 = vadd.f32 %v2163_v3, %v3490_v16 }
 0x1b5   : > { %v874_v34 = vadd.f32 %v2105_v30, %v3468_v39  ;;  %v2165_v9 = vpop.f32.mrf.mxu1 }
 0x1b6   : > { %v2107_v36 = vpop.f32.mrf.mxu0  ;;  %1551 = vst [vmem:[%s3496_s16 + $0x30] sm:$0xff] %v1098_v7  ;;  %v2166_v11 = vadd.f32 %v2165_v9, %v2164_v5 }
 0x1b7   : > { %1537 = vst [vmem:[%s3472_s11 + $0x40] sm:$0xff] %v874_v34  ;;  %v2108_v40 = vadd.f32 %v2107_v36, %v2106_v32  ;;  %2331 = vmatprep.mubr.f32.mxu1 %v874_v34  ;;  %v2167_v14 = vpop.f32.mrf.mxu1 }
 0x1b8   : > { %v2109_v42 = vpop.f32.mrf.mxu0  ;;  %v1101_v17 = vadd.f32 %v2166_v11, %v3490_v16 }
 0x1b9   : > { %v877_v44 = vadd.f32 %v2108_v40, %v3468_v39  ;;  %v2168_v19 = vpop.f32.mrf.mxu1 }
 0x1ba   : > { %v2110_v46 = vpop.f32.mrf.mxu0  ;;  %1552 = vst [vmem:[%s3496_s16 + $0x38] sm:$0xff] %v1101_v17  ;;  %v2169_v21 = vadd.f32 %v2168_v19, %v2167_v14 }
 0x1bb   : > { %1538 = vst [vmem:[%s3472_s11 + $0x48] sm:$0xff] %v877_v44  ;;  %v2111_v48 = vadd.f32 %v2110_v46, %v2109_v42  ;;  %2332 = vmatmul.mubr.f32.gmra.mxu1 %v877_v44  ;;  %v2170_v23 = vpop.f32.mrf.mxu1 }
 0x1bc   : > { %v2112_v50 = vpop.f32.mrf.mxu0  ;;  %v1106_v24 = vadd.f32 %v2169_v21, %v3490_v16 }
 0x1bd   : > { %v882_v28 = vadd.f32 %v2111_v48, %v3468_v39  ;;  %v2171_v29 = vpop.f32.mrf.mxu1 }
 0x1be   : > { %v2113_v49 = vpop.f32.mrf.mxu0  ;;  %1553 = vst [vmem:[%s3496_s16 + $0x40] sm:$0xff] %v1106_v24  ;;  %v2172_v30 = vadd.f32 %v2171_v29, %v2170_v23 }
 0x1bf   : > { %1539 = vst [vmem:[%s3472_s11 + $0x50] sm:$0xff] %v882_v28  ;;  %v2114_v52 = vadd.f32 %v2113_v49, %v2112_v50  ;;  %2334 = vmatprep.mubr.f32.mxu1 %v882_v28  ;;  %v2173_v33 = vpop.f32.mrf.mxu1 }
 0x1c0   : > { %v2115_v54 = vpop.f32.mrf.mxu0  ;;  %v1109_v35 = vadd.f32 %v2172_v30, %v3490_v16 }
 0x1c1   : > { %v885_v56 = vadd.f32 %v2114_v52, %v3468_v39  ;;  %v2174_v38 = vpop.f32.mrf.mxu1 }
 0x1c2   : > { %v2116_v58 = vpop.f32.mrf.mxu0  ;;  %1554 = vst [vmem:[%s3496_s16 + $0x48] sm:$0xff] %v1109_v35 }
 0x1c3   : > { %1540 = vst [vmem:[%s3472_s11 + $0x58] sm:$0xff] %v885_v56  ;;  %v2117_v60 = vadd.f32 %v2116_v58, %v2115_v54  ;;  %2335 = vmatmul.mubr.f32.gmra.mxu1 %v885_v56  ;;  %v2176_v42 = vpop.f32.mrf.mxu1 }
 0x1c4   : > { %v2118_v62 = vpop.f32.mrf.mxu0 }
 0x1c5   : > { %v890_v0 = vadd.f32 %v2117_v60, %v3468_v39  ;;  %v2177_v46 = vpop.f32.mrf.mxu1 }
 0x1c6   : > { %v2119_v2 = vpop.f32.mrf.mxu0  ;;  %v2178_v48 = vadd.f32 %v2177_v46, %v2176_v42 }
 0x1c7   : > { %1541 = vst [vmem:[%s3472_s11 + $0x60] sm:$0xff] %v890_v0  ;;  %v2120_v4 = vadd.f32 %v2119_v2, %v2118_v62  ;;  %2337 = vmatprep.mubr.f32.mxu1 %v890_v0  ;;  %v2179_v50 = vpop.f32.mrf.mxu1 }
 0x1c8   : > { %v2121_v6 = vpop.f32.mrf.mxu0  ;;  %v1117_v28 = vadd.f32 %v2178_v48, %v3490_v16 }
 0x1c9   : > { %v893_v8 = vadd.f32 %v2120_v4, %v3468_v39  ;;  %v2180_v49 = vpop.f32.mrf.mxu1 }
 0x1ca   : > { %v2122_v10 = vpop.f32.mrf.mxu0  ;;  %1556 = vst [vmem:[%s3496_s16 + $0x58] sm:$0xff] %v1117_v28  ;;  %v2181_v52 = vadd.f32 %v2180_v49, %v2179_v50 }
 0x1cb   : > { %1542 = vst [vmem:[%s3472_s11 + $0x68] sm:$0xff] %v893_v8  ;;  %v2123_v12 = vadd.f32 %v2122_v10, %v2121_v6  ;;  %2338 = vmatmul.mubr.f32.gmra.mxu1 %v893_v8  ;;  %v2182_v54 = vpop.f32.mrf.mxu1 }
 0x1cc   : > { %v2124_v15 = vpop.f32.mrf.mxu0  ;;  %v1122_v56 = vadd.f32 %v2181_v52, %v3490_v16 }
 0x1cd   : > { %v898_v18 = vadd.f32 %v2123_v12, %v3468_v39  ;;  %v2183_v58 = vpop.f32.mrf.mxu1 }
 0x1ce   : > { %v2125_v20 = vpop.f32.mrf.mxu0  ;;  %1557 = vst [vmem:[%s3496_s16 + $0x60] sm:$0xff] %v1122_v56  ;;  %v2184_v60 = vadd.f32 %v2183_v58, %v2182_v54 }
 0x1cf   : > { %1543 = vst [vmem:[%s3472_s11 + $0x70] sm:$0xff] %v898_v18  ;;  %v2126_v22 = vadd.f32 %v2125_v20, %v2124_v15  ;;  %2340 = vmatprep.mubr.f32.mxu1 %v898_v18 }
 0x1d0   : > { %v2207_v25 = vpop.f32.mrf.mxu0  ;;  %v2185_v62 = vpop.f32.mrf.mxu1  ;;  %v1125_v0 = vadd.f32 %v2184_v60, %v3490_v16 }
 0x1d1   : > { %v901_v27 = vadd.f32 %v2126_v22, %v3468_v39  ;;  %v2175_v39 = vadd.f32 %v2174_v38, %v2173_v33 }
 0x1d2   : > { %v2208_v32 = vpop.f32.mrf.mxu0  ;;  %v2186_v2 = vpop.f32.mrf.mxu1  ;;  %1558 = vst [vmem:[%s3496_s16 + $0x68] sm:$0xff] %v1125_v0 }
 0x1d3   : > { %1544 = vst [vmem:[%s3472_s11 + $0x78] sm:$0xff] %v901_v27  ;;  %2341 = vmatmul.mubr.f32.gmra.mxu1 %v901_v27  ;;  %v2209_v34 = vadd.f32 %v2208_v32, %v2207_v25  ;;  %v1114_v44 = vadd.f32 %v2175_v39, %v3490_v16  ;;  %v2187_v4 = vadd.f32 %v2186_v2, %v2185_v62 }
 0x1d4   : > { %v2210_v36 = vpop.f32.mrf.mxu0  ;;  %v2188_v6 = vpop.f32.mrf.mxu1 }
 0x1d5   : > { %v1306_v40 = vadd.f32 %v2209_v34, %v3535_v31  ;;  %1555 = vst [vmem:[%s3496_s16 + $0x50] sm:$0xff] %v1114_v44  ;;  %v1130_v8 = vadd.f32 %v2187_v4, %v3490_v16 }
 0x1d6   : > { %v2211_v41 = vpop.f32.mrf.mxu0  ;;  %v2189_v10 = vpop.f32.mrf.mxu1 }
 0x1d7   : > { %1561 = vst [vmem:[%s3542_s18] sm:$0xff] %v1306_v40  ;;  %v2212_v43 = vadd.f32 %v2211_v41, %v2210_v36  ;;  %1559 = vst [vmem:[%s3496_s16 + $0x70] sm:$0xff] %v1130_v8  ;;  %v2190_v12 = vadd.f32 %v2189_v10, %v2188_v6 }
 0x1d8   : > { %v2213_v45 = vpop.f32.mrf.mxu0 }
 0x1d9   : > { %v1309_v47 = vadd.f32 %v2212_v43, %v3535_v31  ;;  %v1133_v17 = vadd.f32 %v2190_v12, %v3490_v16 }
 0x1da   : > { %v2214_v13 = vpop.f32.mrf.mxu0 }
 0x1db   : > { %1562 = vst [vmem:[%s3542_s18 + $0x8] sm:$0xff] %v1309_v47  ;;  %v2215_v26 = vadd.f32 %v2214_v13, %v2213_v45  ;;  %1560 = vst [vmem:[%s3496_s16 + $0x78] sm:$0xff] %v1133_v17  ;;  %s2959_s16 = smov [#allocation12]  }
 0x1dc   : > { %v2216_v37 = vpop.f32.mrf.mxu0  ;;  %s2708_s20 = sshll.u32 %s2959_s16, 4  ;;  %s2709_s20 = int_to_ptr.vmem [resolvable:$false] %s2708_s20 }
 0x1dd   : > { %v1314_v51 = vadd.f32 %v2215_v26, %v3535_v31  ;;  %s2710_s13 = scalar_lea.vmem %s2709_s20, 4096  ;;  %p2711_p8 = scmp.lt.s32.totalorder %s3598_s17, %s2709_s20 }
 0x1de   : > { %v2217_v53 = vpop.f32.mrf.mxu0  ;;  %p2712_p12 = scmp.lt.s32.totalorder %s2710_s13, %s2704_s10 }
 0x1df   : > { %1563 = vst [vmem:[%s3542_s18 + $0x10] sm:$0xff] %v1314_v51  ;;  %v2218_v55 = vadd.f32 %v2217_v53, %v2216_v37 }
 0x1e0   : > { %v2219_v57 = vpop.f32.mrf.mxu0  ;;  %p2713_p5 = por %p2712_p12, %p2711_p8 }
 0x1e1   : > { %v1317_v59 = vadd.f32 %v2218_v55, %v3535_v31 }
 0x1e2   : > { %v2220_v61 = vpop.f32.mrf.mxu0  ;;  %p2714_p7 = pnand %p2713_p5, %p2707_p6 }
 0x1e3   : > { %1564 = vst [vmem:[%s3542_s18 + $0x18] sm:$0xff] %v1317_v59  ;;  %v2221_v63 = vadd.f32 %v2220_v61, %v2219_v57 }
 0x1e4   : > { %v2222_v1 = vpop.f32.mrf.mxu0 }
 0x1e5   : > { %v1322_v3 = vadd.f32 %v2221_v63, %v3535_v31 }
 0x1e6   : > { %v2223_v5 = vpop.f32.mrf.mxu0 }
 0x1e7   : > { %1565 = vst [vmem:[%s3542_s18 + $0x20] sm:$0xff] %v1322_v3  ;;  %v2224_v7 = vadd.f32 %v2223_v5, %v2222_v1 }
 0x1e8   : > { %v2225_v9 = vpop.f32.mrf.mxu0 }
 0x1e9   : > { %v1325_v11 = vadd.f32 %v2224_v7, %v3535_v31 }
 0x1ea   : > { %v2226_v14 = vpop.f32.mrf.mxu0 }
 0x1eb   : > { %1566 = vst [vmem:[%s3542_s18 + $0x28] sm:$0xff] %v1325_v11  ;;  %v2227_v15 = vadd.f32 %v2226_v14, %v2225_v9 }
 0x1ec   : > { %v2228_v18 = vpop.f32.mrf.mxu0 }
 0x1ed   : > { %v1330_v19 = vadd.f32 %v2227_v15, %v3535_v31 }
 0x1ee   : > { %v2229_v20 = vpop.f32.mrf.mxu0 }
 0x1ef   : > { %1567 = vst [vmem:[%s3542_s18 + $0x30] sm:$0xff] %v1330_v19  ;;  %v2230_v21 = vadd.f32 %v2229_v20, %v2228_v18 }
 0x1f0   : > { %v2231_v22 = vpop.f32.mrf.mxu0 }
 0x1f1   : > { %v1333_v23 = vadd.f32 %v2230_v21, %v3535_v31 }
 0x1f2   : > { %v2232_v24 = vpop.f32.mrf.mxu0 }
 0x1f3   : > { %1568 = vst [vmem:[%s3542_s18 + $0x38] sm:$0xff] %v1333_v23  ;;  %v2233_v25 = vadd.f32 %v2232_v24, %v2231_v22 }
 0x1f4   : > { %v2234_v27 = vpop.f32.mrf.mxu0 }
 0x1f5   : > { %v1338_v29 = vadd.f32 %v2233_v25, %v3535_v31 }
 0x1f6   : > { %v2235_v30 = vpop.f32.mrf.mxu0 }
 0x1f7   : > { %1569 = vst [vmem:[%s3542_s18 + $0x40] sm:$0xff] %v1338_v29  ;;  %v2236_v16 = vadd.f32 %v2235_v30, %v2234_v27 }
 0x1f8   : > { %v2237_v32 = vpop.f32.mrf.mxu0 }
 0x1f9   : > { %v1341_v33 = vadd.f32 %v2236_v16, %v3535_v31 }
 0x1fa   : > { %v2238_v34 = vpop.f32.mrf.mxu0 }
 0x1fb   : > { %1570 = vst [vmem:[%s3542_s18 + $0x48] sm:$0xff] %v1341_v33  ;;  %v2239_v35 = vadd.f32 %v2238_v34, %v2237_v32 }
 0x1fc   : > { %v2240_v36 = vpop.f32.mrf.mxu0 }
 0x1fd   : > { %v1346_v38 = vadd.f32 %v2239_v35, %v3535_v31 }
 0x1fe   : > { %v2241_v40 = vpop.f32.mrf.mxu0 }
 0x1ff   : > { %1571 = vst [vmem:[%s3542_s18 + $0x50] sm:$0xff] %v1346_v38  ;;  %v2242_v39 = vadd.f32 %v2241_v40, %v2240_v36 }
 0x200   : > { %v2243_v41 = vpop.f32.mrf.mxu0 }
 0x201   : > { %v1349_v42 = vadd.f32 %v2242_v39, %v3535_v31 }
 0x202   : > { %v2244_v43 = vpop.f32.mrf.mxu0 }
 0x203   : > { %1572 = vst [vmem:[%s3542_s18 + $0x58] sm:$0xff] %v1349_v42  ;;  %v2245_v44 = vadd.f32 %v2244_v43, %v2243_v41 }
 0x204   : > { %v2246_v45 = vpop.f32.mrf.mxu0 }
 0x205   : > { %v1354_v46 = vadd.f32 %v2245_v44, %v3535_v31 }
 0x206   : > { %v2247_v47 = vpop.f32.mrf.mxu0 }
 0x207   : > { %1573 = vst [vmem:[%s3542_s18 + $0x60] sm:$0xff] %v1354_v46  ;;  %v2248_v48 = vadd.f32 %v2247_v47, %v2246_v45 }
 0x208   : > { %v2249_v13 = vpop.f32.mrf.mxu0 }
 0x209   : > { %v1357_v50 = vadd.f32 %v2248_v48, %v3535_v31 }
 0x20a   : > { %v2250_v26 = vpop.f32.mrf.mxu0 }
 0x20b   : > { %1574 = vst [vmem:[%s3542_s18 + $0x68] sm:$0xff] %v1357_v50  ;;  %v2251_v28 = vadd.f32 %v2250_v26, %v2249_v13 }
 0x20c   : > { %v2252_v37 = vpop.f32.mrf.mxu0 }
 0x20d   : > { %v1362_v49 = vadd.f32 %v2251_v28, %v3535_v31 }
 0x20e   : > { %v2253_v51 = vpop.f32.mrf.mxu0 }
 0x20f   : > { %1575 = vst [vmem:[%s3542_s18 + $0x70] sm:$0xff] %v1362_v49  ;;  %v2254_v52 = vadd.f32 %v2253_v51, %v2252_v37 }
 0x211   : > { %v1365_v53 = vadd.f32 %v2254_v52, %v3535_v31 }
 0x213   : > { %1576 = vst [vmem:[%s3542_s18 + $0x78] sm:$0xff] %v1365_v53 }
 0x214   : > { %2717 = shalt.err (!%p2714_p7)
}
 0x215   : > { %s2718_s1 = scalar_lea.hbm %s3596_s21, 2048  ;;  %s2722_s24 = scalar_lea.hbm %s3904_s15, 8192 }
 0x216   : > { %p2719_p11 = scmp.ne.s32.totalorder %s3596_s21, %s2718_s1  ;;  %p2723_p4 = scmp.lt.s32.totalorder %s3596_s21, %s3904_s15 }
 0x217   : > { %p2724_p3 = scmp.lt.s32.totalorder %s2722_s24, %s2718_s1 }
 0x218   : > { %p2720_p0 = pnand %p2719_p11, %p3906_p1 }
 0x219   : > { %p2725_p2 = por %p2724_p3, %p2723_p4 }
 0x21a   : > { %p2721_p13 = pneg %p2720_p0 }
 0x21c   : > { %p2726_p10 = pnand %p2725_p2, %p2721_p13 }
 0x21e   : > { %2729 = shalt.err (!%p2726_p10)
}
 0x21f   : > { %s2960_s10 = smov 128   ;;  %s2961_s20 = smov 8  }
 0x220   : > { %2356 = dma.vmem_to_hbm [thread:$0]  (%p3906_p1), %s3598_s17, 2048, %s3596_s21, %s3839_s22, %s2960_s10, %s2960_s10, %s2961_s20  }
 0x221   : > { %s3907_s7 = sld [smem:[#allocation47_spill]]  ;;  %s1624_s24 = sshll.u32 %s3472_s11, 4  ;;  %s3639_s24 = int_to_ptr.vmem [resolvable:$true] %s1624_s24 }
 0x222   : > { %s1594_s16 = scalar_lea.sflag [#allocation4], %s3459_s28  ;;  %s2730_s3 = scalar_lea.vmem %s3639_s24, 2048 }
 0x223   : > { %p2731_p9 = scmp.ne.s32.totalorder %s3639_s24, %s2730_s3  ;;  %s2962_s5 = smov [#allocation11]  }
 0x224   : > { %s2734_s17 = sshll.u32 %s2962_s5, 4  ;;  %s2735_s17 = int_to_ptr.vmem [resolvable:$false] %s2734_s17 }
 0x225   : > { %p2732_p6 = pnand %p2731_p9, %p3906_p1  ;;  %s2736_s21 = scalar_lea.vmem %s2735_s17, 4096 }
 0x226   : > { %p2737_p12 = scmp.lt.s32.totalorder %s3639_s24, %s2735_s17  ;;  %p2738_p5 = scmp.lt.s32.totalorder %s2736_s21, %s2730_s3 }
 0x227   : > { %s3636_s23 = scalar_lea.hbm %s3907_s7, %s3589_s27  ;;  %p2733_p8 = pneg %p2732_p6 }
 0x228   : > { %p2739_p7 = por %p2738_p5, %p2737_p12 }
 0x22a   : > { %p2740_p11 = pnand %p2739_p7, %p2733_p8 }
 0x22c   : > { %2743 = shalt.err (!%p2740_p11)
}
 0x22d   : > { %s2744_s11 = scalar_lea.hbm %s3636_s23, 2048  ;;  %s2748_s5 = scalar_lea.hbm %s3907_s7, 8192 }
 0x22e   : > { %p2745_p0 = scmp.ne.s32.totalorder %s3636_s23, %s2744_s11  ;;  %p2749_p3 = scmp.lt.s32.totalorder %s3636_s23, %s3907_s7 }
 0x22f   : > { %p2750_p2 = scmp.lt.s32.totalorder %s2748_s5, %s2744_s11 }
 0x230   : > { %p2746_p13 = pnand %p2745_p0, %p3906_p1 }
 0x231   : > { %p2751_p10 = por %p2750_p2, %p2749_p3 }
 0x232   : > { %p2747_p4 = pneg %p2746_p13 }
 0x234   : > { %p2752_p9 = pnand %p2751_p10, %p2747_p4 }
 0x236   : > { %2755 = shalt.err (!%p2752_p9)
}
 0x237   : > { %2355 = dma.vmem_to_hbm [thread:$0]  (%p3906_p1), %s3639_s24, 2048, %s3636_s23, %s1594_s16, %s2960_s10, %s2960_s10, %s2961_s20  }
 0x238   : > { %s3908_s3 = sshll.u32 %s3542_s18, 4  ;;  %s2963_s22 = smov [#allocation14]   ;;  %s1661_s3 = int_to_ptr.vmem [resolvable:$true] %s3908_s3 }
 0x239   : > { %s2756_s17 = scalar_lea.vmem %s1661_s3, 2048  ;;  %s2760_s8 = sshll.u32 %s2963_s22, 4  ;;  %s2761_s8 = int_to_ptr.vmem [resolvable:$false] %s2760_s8 }
 0x23a   : > { %p2757_p6 = scmp.ne.s32.totalorder %s1661_s3, %s2756_s17  ;;  %s2762_s21 = scalar_lea.vmem %s2761_s8, 4096 }
 0x23b   : > { %p2763_p5 = scmp.lt.s32.totalorder %s1661_s3, %s2761_s8  ;;  %p2764_p7 = scmp.lt.s32.totalorder %s2762_s21, %s2756_s17 }
 0x23c   : > { %p2758_p8 = pnand %p2757_p6, %p3906_p1 }
 0x23d   : > { %p2765_p11 = por %p2764_p7, %p2763_p5 }
 0x23e   : > { %p2759_p12 = pneg %p2758_p8 }
 0x240   : > { %p2766_p0 = pnand %p2765_p11, %p2759_p12 }
 0x242   : > { %2769 = shalt.err (!%p2766_p0)
}
 0x243   : > { %s2770_s18 = scalar_lea.hbm %s3604_s4, 2048  ;;  %s2774_s16 = scalar_lea.hbm %s3905_s0, 8192 }
 0x244   : > { %p2771_p13 = scmp.ne.s32.totalorder %s3604_s4, %s2770_s18  ;;  %p2775_p2 = scmp.lt.s32.totalorder %s3604_s4, %s3905_s0 }
 0x245   : > { %p2776_p10 = scmp.lt.s32.totalorder %s2774_s16, %s2770_s18 }
 0x246   : > { %p2772_p4 = pnand %p2771_p13, %p3906_p1 }
 0x247   : > { %p2777_p9 = por %p2776_p10, %p2775_p2 }
 0x248   : > { %p2773_p3 = pneg %p2772_p4 }
 0x24a   : > { %p2778_p6 = pnand %p2777_p9, %p2773_p3 }
 0x24c   : > { %2781 = shalt.err (!%p2778_p6)
}
 0x24d   : > { %s3909_s1 = scalar_lea.sflag [#allocation13], %s3281_s2  ;;  %s3690_s5 = scalar_lea.vmem [#allocation15], %s3466_s9 }
 0x24e   : > { %2357 = dma.vmem_to_hbm [thread:$0]  (%p3906_p1), %s1661_s3, 2048, %s3604_s4, %s3909_s1, %s2960_s10, %s2960_s10, %s2961_s20  }
 0x24f   : > { %s1678_s2 = sshll.u32 %s3690_s5, 4  ;;  %s3910_s3 = sld [smem:[#allocation50_spill]]  ;;  %s3714_s2 = int_to_ptr.vmem [resolvable:$true] %s1678_s2 }
 0x250   : > { %s1609_s22 = scalar_lea.sflag [#allocation16], %s3459_s28  ;;  %s2782_s8 = scalar_lea.vmem %s3714_s2, 2048 }
 0x251   : > { %p2783_p8 = scmp.ne.s32.totalorder %s3714_s2, %s2782_s8  ;;  %s2964_s21 = smov [#allocation15]  }
 0x252   : > { %s2786_s18 = sshll.u32 %s2964_s21, 4  ;;  %s2787_s18 = int_to_ptr.vmem [resolvable:$false] %s2786_s18 }
 0x253   : > { %p2784_p12 = pnand %p2783_p8, %p3906_p1  ;;  %s2788_s23 = scalar_lea.vmem %s2787_s18, 4096 }
 0x254   : > { %p2789_p7 = scmp.lt.s32.totalorder %s3714_s2, %s2787_s18  ;;  %p2790_p11 = scmp.lt.s32.totalorder %s2788_s23, %s2782_s8 }
 0x255   : > { %s3712_s17 = scalar_lea.hbm %s3910_s3, %s3589_s27  ;;  %p2785_p5 = pneg %p2784_p12 }
 0x256   : > { %p2791_p0 = por %p2790_p11, %p2789_p7 }
 0x258   : > { %p2792_p13 = pnand %p2791_p0, %p2785_p5 }
 0x25b   : > { %v2321_v31 = vpop.f32.mrf.mxu1 }
 0x25c   : > { %1578 = vst [vmem:[%s3690_s5 + $0x8] sm:$0xff] %v2321_v31 }
 0x25d   : > { %v1450_v54 = vpop.f32.mrf.mxu1 }
 0x25e   : > { %1577 = vst [vmem:[%s3690_s5] sm:$0xff] %v1450_v54 }
 0x263   : > { %v2324_v55 = vpop.f32.mrf.mxu1 }
 0x264   : > { %1580 = vst [vmem:[%s3690_s5 + $0x18] sm:$0xff] %v2324_v55 }
 0x265   : > { %v1460_v56 = vpop.f32.mrf.mxu1 }
 0x266   : > { %1579 = vst [vmem:[%s3690_s5 + $0x10] sm:$0xff] %v1460_v56 }
 0x26b   : > { %v2327_v57 = vpop.f32.mrf.mxu1 }
 0x26c   : > { %1582 = vst [vmem:[%s3690_s5 + $0x28] sm:$0xff] %v2327_v57 }
 0x26d   : > { %v1470_v58 = vpop.f32.mrf.mxu1 }
 0x26e   : > { %1581 = vst [vmem:[%s3690_s5 + $0x20] sm:$0xff] %v1470_v58 }
 0x273   : > { %v2330_v59 = vpop.f32.mrf.mxu1 }
 0x274   : > { %1584 = vst [vmem:[%s3690_s5 + $0x38] sm:$0xff] %v2330_v59 }
 0x275   : > { %v1480_v60 = vpop.f32.mrf.mxu1 }
 0x276   : > { %1583 = vst [vmem:[%s3690_s5 + $0x30] sm:$0xff] %v1480_v60 }
 0x27b   : > { %v2333_v61 = vpop.f32.mrf.mxu1 }
 0x27c   : > { %1586 = vst [vmem:[%s3690_s5 + $0x48] sm:$0xff] %v2333_v61 }
 0x27d   : > { %v1490_v62 = vpop.f32.mrf.mxu1 }
 0x27e   : > { %1585 = vst [vmem:[%s3690_s5 + $0x40] sm:$0xff] %v1490_v62 }
 0x283   : > { %v2336_v63 = vpop.f32.mrf.mxu1 }
 0x284   : > { %1588 = vst [vmem:[%s3690_s5 + $0x58] sm:$0xff] %v2336_v63 }
 0x285   : > { %v1500_v0 = vpop.f32.mrf.mxu1 }
 0x286   : > { %1587 = vst [vmem:[%s3690_s5 + $0x50] sm:$0xff] %v1500_v0 }
 0x28b   : > { %v2339_v1 = vpop.f32.mrf.mxu1 }
 0x28c   : > { %1590 = vst [vmem:[%s3690_s5 + $0x68] sm:$0xff] %v2339_v1 }
 0x28d   : > { %v1510_v2 = vpop.f32.mrf.mxu1 }
 0x28e   : > { %1589 = vst [vmem:[%s3690_s5 + $0x60] sm:$0xff] %v1510_v2 }
 0x293   : > { %v2342_v3 = vpop.f32.mrf.mxu1 }
 0x294   : > { %1592 = vst [vmem:[%s3690_s5 + $0x78] sm:$0xff] %v2342_v3 }
 0x295   : > { %v1520_v4 = vpop.f32.mrf.mxu1 }
 0x296   : > { %1591 = vst [vmem:[%s3690_s5 + $0x70] sm:$0xff] %v1520_v4 }
 0x297   : > { %2795 = shalt.err (!%p2792_p13)
}
 0x298   : > { %s2796_s27 = scalar_lea.hbm %s3712_s17, 2048  ;;  %s2800_s16 = scalar_lea.hbm %s3910_s3, 8192 }
 0x299   : > { %p2797_p4 = scmp.ne.s32.totalorder %s3712_s17, %s2796_s27  ;;  %p2801_p10 = scmp.lt.s32.totalorder %s3712_s17, %s3910_s3 }
 0x29a   : > { %p2802_p9 = scmp.lt.s32.totalorder %s2800_s16, %s2796_s27 }
 0x29b   : > { %p2798_p3 = pnand %p2797_p4, %p3906_p1 }
 0x29c   : > { %p2803_p6 = por %p2802_p9, %p2801_p10 }
 0x29d   : > { %p2799_p2 = pneg %p2798_p3 }
 0x29f   : > { %p2804_p8 = pnand %p2803_p6, %p2799_p2 }
 0x2a1   : > { %2807 = shalt.err (!%p2804_p8)
}
 0x2a2   : > { %2358 = dma.vmem_to_hbm [thread:$0]  (%p3906_p1), %s3714_s2, 2048, %s3712_s17, %s1609_s22, %s2960_s10, %s2960_s10, %s2961_s20  }
 0x2a3 PF: > { %s3911_s1 = sld [smem:[#allocation24_spill]]  ;;  %p2396_p12 = scmp.ge.s32.totalorder %s2946_s30, 2 }
 0x2a4   : > { %s3912_s5 = sld [smem:[#allocation36_spill]] }
 0x2a9   : > { %s1693_s9 = sand.u32 1, %s3911_s1  }
 0x2aa   : > { %p3913_p5 = scmp.ne.s32.totalorder %s3912_s5, 0  ;;  %s1694_s4 = scalar_lea.sflag [#allocation4], %s1693_s9 }
 0x2ac   : > { %p2381_p7 = pnand %p2396_p12, %p3913_p5 }
 0x2ae   : > { %p2382_p11 = pneg %p2381_p7 }
 0x2b0   : > { %2881 = dma.done.wait (%p2382_p11), %s1694_s4, 2048  }
 0x2b1   : > { %2883 = vsyncadd (%p2382_p11), %s1694_s4, 4294965248  ;;  %s3914_s26 = sadd.s32 4294967294, %s2946_s30  }
 0x2b2   : > { %s1702_s8 = sand.u32 1, %s3914_s26  }
 0x2b3   : > { %s1703_s21 = scalar_lea.sflag [#allocation13], %s1702_s8 }
 0x2b4   : > { %2885 = dma.done.wait (%p2382_p11), %s1703_s21, 4096  }
 0x2b5   : > { %2887 = vsyncadd (%p2382_p11), %s1703_s21, 4294963200  ;;  %s1721_s18 = scalar_lea.sflag [#allocation16], %s1693_s9 }
 0x2b6   : > { %2889 = dma.done.wait (%p2382_p11), %s1721_s18, 2048  }
 0x2b7   : > { %2891 = vsyncadd (%p2382_p11), %s1721_s18, 4294965248  ;;  %s40_s30 = sadd.s32 1, %s2946_s30   ;;  %s3916_s17 = sld [smem:[#allocation25_spill]] }
 0x2b8   : > { %p3748_p1 = scmp.ge.s32.totalorder %s40_s30, 6   ;;  %s3917_s20 = sld [smem:[#allocation26_spill]] }
 0x2b9   : > { %s3918_s21 = sld [smem:[#allocation27_spill]]  ;;  %s3923_s18 = smov %s2902_s19 }
 0x2ba   : > { %s3919_s22 = sld [smem:[#allocation38_spill]]  ;;  %s3924_s19 = smov %s3227_s14 }
 0x2bb   : > { %s3920_s23 = sld [smem:[#allocation28_spill]]  ;;  %s3925_s24 = smov %s2926_s25 }
 0x2bc   : > { %s3921_s26 = sld [smem:[#allocation31_spill]]  ;;  %s3926_s25 = smov %s3224_s12 }
 0x2bd   : > { %s3922_s28 = sld [smem:[#allocation37_spill]]  ;;  %s3927_s27 = smov %s2942_s29 }
 0x2be   : > { %s3928_s29 = smov %s3934_s6  ;;  %39 = sbr.rel (!%p3748_p1) target bundleno = 31 (0x1f), region = 196 }
 0x2c3   :  { %1726 = vsyncpa [#allocation3], 1 }
 0x2c4   :  { %1728 = vsyncpa [#allocation3 + $0x1], 1 }
 0x2c5   :  { %1729 = vsyncpa [#allocation6], 1 }
 0x2c6   :  { %1731 = vsyncpa [#allocation6 + $0x1], 1 }
 0x2c7   :  { %1732 = vsyncpa [#allocation9], 1 }
 0x2c8   :  { %1734 = vsyncpa [#allocation9 + $0x1], 1 }
 0x2c9   :  { %1735 = vsyncpa [#allocation4], 1 }
 0x2ca   :  { %1737 = vsyncpa [#allocation4 + $0x1], 1 }
 0x2cb   :  { %1738 = vsyncpa [#allocation13], 1 }
 0x2cc   :  { %1740 = vsyncpa [#allocation13 + $0x1], 1 }
 0x2cd   :  { %1741 = vsyncpa [#allocation16], 1 }
 0x2ce   :  { %1743 = vsyncpa [#allocation16 + $0x1], 1 }

</bundles_post_ra>
